<compile_context>
chip_gen: v6e
topology: v6e:2x2x1
jax: 0.10.0
libtpu: 0.0.40
codegen_flags: <defaults>
</compile_context>

<pallas_src>
import functools

import jax
import jax.numpy as jnp
from jax import lax
from jax.experimental import pallas as pl
from jax.experimental.pallas import tpu as pltpu

EPS = 1e-5
INV_SQRT2 = 0.7071067811865476
N_GROUPS = 8


# ----------------------------------------------------------------------------
# Pallas kernel: one block of `btile` whole samples per grid step.
# All activations are 2D (rows = batch*length flattened, lanes = channels).
# ----------------------------------------------------------------------------
def _decoder1d_kernel(L2, fold_rows, x_ref, skip_ref, mnf_ref, mnl_ref,
                      wxu_ref, ws_ref, bias_ref, gamma_ref, beta_ref, ggt_ref,
                      out_ref):
    cout = gamma_ref.shape[1]
    n4 = 4 * cout
    skip = skip_ref[...]                         # (btile*2L, Cin)
    M2 = skip.shape[0]
    Bt = M2 // L2

    # ConvTranspose1d(k=2, s=2) folded through the fused conv/residual weights:
    # one matmul on the L-length rows yields even/odd partial sums (8*Cout
    # lanes); a single sublane interleave puts them in time order.
    zz = jnp.dot(x_ref[...], wxu_ref[...],
                 preferred_element_type=jnp.float32)          # (btile*L, 8*Cout)
    comb_up = jnp.stack([zz[:, :n4], zz[:, n4:]], axis=1).reshape(M2, n4)

    # fused [conv_tap0 | conv_tap1 | conv_tap2 | residual]; biases pre-folded.
    comb = (comb_up
            + jnp.dot(skip, ws_ref[...], preferred_element_type=jnp.float32)
            + bias_ref[...])                                  # (M2, 4*Cout)
    p0 = comb[:, 0 * cout:1 * cout]
    p1 = comb[:, 1 * cout:2 * cout]                           # conv bias folded here
    p2 = comb[:, 2 * cout:3 * cout]
    res = comb[:, 3 * cout:4 * cout]                          # residual (+ its bias)

    # k=3 "same" conv: neighbour rows via XLU sublane rolls; sequence edges are
    # zeroed with precomputed masks (no in-kernel iota / compares).
    left = mnf_ref[...] * pltpu.roll(p0, 1, axis=0)           # p0[t-1]
    right = mnl_ref[...] * pltpu.roll(p2, M2 - 1, axis=0)     # p2[t+1]
    conv = left + p1 + right                                  # (M2, Cout)

    # GroupNorm(8): per-sample stats via a free sublane reshape + reduction;
    # group replication across channels is a tiny (Cout, Cout) matmul.
    conv3 = conv.reshape(Bt, L2, cout)
    inv_n = 1.0 / float(L2 * (cout // N_GROUPS))
    ssum = jnp.sum(conv3, axis=1)                             # (Bt, Cout)
    ssq = jnp.sum(conv3 * conv3, axis=1)                      # (Bt, Cout)
    mean_c = jnp.dot(ssum, ggt_ref[...], preferred_element_type=jnp.float32) * inv_n
    msq_c = jnp.dot(ssq, ggt_ref[...], preferred_element_type=jnp.float32) * inv_n
    var_c = jnp.maximum(msq_c - mean_c * mean_c, 0.0)
    scale_c = lax.rsqrt(var_c + EPS) * gamma_ref[...]         # (Bt, Cout)
    shift_c = beta_ref[...] - mean_c * scale_c
    scale_r = jnp.broadcast_to(scale_c[:, None, :], (Bt, L2, cout)).reshape(M2, cout)
    shift_r = jnp.broadcast_to(shift_c[:, None, :], (Bt, L2, cout)).reshape(M2, cout)
    normed = conv * scale_r + shift_r

    # exact (erf) GELU; Dropout1d is identity in eval mode.
    act = 0.5 * normed * (1.0 + lax.erf(normed * INV_SQRT2))
    y = act + res                                             # (M2, Cout)

    if fold_rows:
        y = y.reshape(fold_rows, 128)                         # lane-dense store
    out_ref[...] = y.astype(out_ref.dtype)


# ----------------------------------------------------------------------------
# Wrapper helpers
# ----------------------------------------------------------------------------
def pack_params(params, cin, cout):
    """Fold natural-layout params into the fused layout the kernel consumes."""
    wt, bt = params["wt"], params["bt"]          # (2, Cin, Cout), (1, Cout)
    wc, bc = params["wc"], params["bc"]          # (3, Cout+Cin, Cout), (1, Cout)
    wr, br = params["wr"], params["br"]          # (Cout+Cin, Cout), (1, Cout)

    # concat order in the module is [up(Cout) | skip(Cin)] along channels.
    wu = jnp.concatenate([wc[0, :cout], wc[1, :cout], wc[2, :cout],
                          wr[:cout]], axis=1)                            # (Cout, 4*Cout)
    ws = jnp.concatenate([wc[0, cout:], wc[1, cout:], wc[2, cout:],
                          wr[cout:]], axis=1)                            # (Cin, 4*Cout)
    # ConvTranspose taps folded through the fused up-weight -> one x-matmul.
    wxu = jnp.concatenate([wt[0] @ wu, wt[1] @ wu], axis=1)              # (Cin, 8*Cout)
    zero = jnp.zeros_like(bc)
    bias_f = jnp.concatenate([zero, bc, zero, br], axis=1) + bt @ wu     # (1, 4*Cout)

    gs = cout // N_GROUPS
    ch = jnp.arange(cout)
    ggt = (ch[:, None] // gs == ch[None, :] // gs).astype(jnp.float32)   # (Cout, Cout)
    return wxu, ws, bias_f, params["gamma"], params["beta"], ggt


def _edge_masks(rows, L2, cout):
    """0/1 masks zeroing the rolled-in rows at per-sample sequence edges."""
    t = jnp.arange(rows) % L2
    nf = jnp.broadcast_to((t != 0)[:, None], (rows, cout)).astype(jnp.float32)
    nl = jnp.broadcast_to((t != L2 - 1)[:, None], (rows, cout)).astype(jnp.float32)
    return nf, nl


def _pick_batch_tile(B, L, cout, *, lane_dense, max_rows=2048, min_steps=2):
    """Largest divisor of B honouring the (8,128) block rules (f32 sublane=8),
    keeping >= min_steps grid steps (v7x has 2 TensorCores) and <= max_rows."""
    L2 = 2 * L
    R = (128 // cout) if (cout <= 128 and 128 % cout == 0) else 1

    def feasible(d):
        if B % d:
            return False
        if d == B:                                # full-extent blocks always legal
            return True
        if (d * L) % 8 or (d * L2) % 8:           # x / skip block sublane rule
            return False
        if lane_dense:
            if (d * L2) % R:
                return False
            if ((d * L2 * cout) // 128) % 8:      # lane-dense out block sublane rule
                return False
        return True

    cands = [d for d in range(1, B + 1) if feasible(d)]

    def score(d):
        rows = d * L2
        fits = rows <= max_rows
        return ((B // d) >= min_steps, fits, rows if fits else -rows)

    return max(cands, key=score)


def decoder1d_pallas(x, skip, params, *, batch_tile=None, lane_dense=None):
    """x: (B, L, Cin), skip: (B, 2L, Cin), channels-last.  Returns (B, 2L, Cout).

    Pass bf16 x/skip/params on v6e/v7x to halve HBM traffic; matmuls accumulate
    in f32 and GroupNorm/GELU math stays f32 regardless of the input dtype.
    """
    B, L, cin = x.shape
    L2 = 2 * L
    cout = params["wt"].shape[2]
    assert cout % N_GROUPS == 0, "GroupNorm(8) needs out_ch % 8 == 0"
    assert skip.shape == (B, L2, cin)

    wxu, ws, bias_f, gamma, beta, ggt = pack_params(params, cin, cout)
    # Flatten batch*length so in-kernel matmuls get an MXU-sized M dimension.
    x2 = x.reshape(B * L, cin)
    skip2 = skip.reshape(B * L2, cin)

    lane_ok = cout <= 128 and 128 % cout == 0 and (B * L2 * cout) % 128 == 0
    want_dense = lane_ok and lane_dense is not False

    btile = (batch_tile if batch_tile is not None
             else _pick_batch_tile(B, L, cout, lane_dense=want_dense))
    assert B % btile == 0
    rows_x, rows_s = btile * L, btile * L2
    want_dense = want_dense and (rows_s * cout) % 128 == 0
    grid = (B // btile,)

    mnf, mnl = _edge_masks(rows_s, L2, cout)

    def run(dense):
        fold_rows = (rows_s * cout) // 128 if dense else 0

        def fixed(shape):
            return pl.BlockSpec(shape, lambda g: (0, 0))

        in_specs = [
            pl.BlockSpec((rows_x, cin), lambda g: (g, 0)),     # x    (flattened)
            pl.BlockSpec((rows_s, cin), lambda g: (g, 0)),     # skip (flattened)
            fixed(mnf.shape), fixed(mnl.shape),                # conv edge masks
            fixed(wxu.shape), fixed(ws.shape), fixed(bias_f.shape),
            fixed(gamma.shape), fixed(beta.shape), fixed(ggt.shape),
        ]
        if dense:
            out_specs = pl.BlockSpec((fold_rows, 128), lambda g: (g, 0))
            out_shape = jax.ShapeDtypeStruct(((B * L2 * cout) // 128, 128), x.dtype)
        else:
            out_specs = pl.BlockSpec((rows_s, cout), lambda g: (g, 0))
            out_shape = jax.ShapeDtypeStruct((B * L2, cout), x.dtype)

        out = pl.pallas_call(
            functools.partial(_decoder1d_kernel, L2, fold_rows),
            grid=grid,
            in_specs=in_specs,
            out_specs=out_specs,
            out_shape=out_shape,
            compiler_params=pltpu.CompilerParams(
                dimension_semantics=("parallel",)),
        )(x2, skip2, mnf, mnl, wxu, ws, bias_f, gamma, beta, ggt)
        return out.reshape(B, L2, cout)

    if want_dense:
        try:
            return run(True)
        except Exception:                         # noqa: BLE001
            if lane_dense is True:
                raise
            # Some Mosaic versions cannot lower the (rows, Cout) ->
            # (rows*Cout/128, 128) value reshape; retry with the plain
            # channel-minor output layout (semantically identical).
    return run(False)


# ----------------------------------------------------------------------------
# Pure-JAX reference (natural weight layout) for validation.
# ----------------------------------------------------------------------------
def decoder1d_ref(x, skip, params):
    B, L, cin = x.shape
    wt, bt = params["wt"], params["bt"]
    wc, bc = params["wc"], params["bc"]
    gamma, beta = params["gamma"], params["beta"]
    wr, br = params["wr"], params["br"]
    cout = wt.shape[2]

    y0 = x @ wt[0] + bt
    y1 = x @ wt[1] + bt
    up = jnp.stack([y0, y1], axis=2).reshape(B, 2 * L, cout)
    xcat = jnp.concatenate([up, skip], axis=-1)
    residual = xcat @ wr + br

    xpad = jnp.pad(xcat, ((0, 0), (1, 1), (0, 0)))
    conv = (xpad[:, :-2] @ wc[0] + xpad[:, 1:-1] @ wc[1]
            + xpad[:, 2:] @ wc[2] + bc)

    g = conv.reshape(B, 2 * L, N_GROUPS, cout // N_GROUPS)
    mean = g.mean(axis=(1, 3), keepdims=True)
    var = ((g - mean) ** 2).mean(axis=(1, 3), keepdims=True)
    normed = ((g - mean) * lax.rsqrt(var + EPS)).reshape(B, 2 * L, cout)
    normed = normed * gamma + beta
    act = 0.5 * normed * (1.0 + lax.erf(normed * INV_SQRT2))
    return act + residual


# ----------------------------------------------------------------------------
def make_params(key, cin, cout):
    ks = jax.random.split(key, 8)
    ccat = cin + cout
    return {
        "wt": jax.random.normal(ks[0], (2, cin, cout), jnp.float32) * 0.1,
        "bt": jax.random.normal(ks[1], (1, cout), jnp.float32) * 0.05,
        "wc": jax.random.normal(ks[2], (3, ccat, cout), jnp.float32) * 0.1,
        "bc": jax.random.normal(ks[3], (1, cout), jnp.float32) * 0.05,
        "gamma": 1.0 + 0.1 * jax.random.normal(ks[4], (1, cout), jnp.float32),
        "beta": 0.1 * jax.random.normal(ks[5], (1, cout), jnp.float32),
        "wr": jax.random.normal(ks[6], (ccat, cout), jnp.float32) * 0.1,
        "br": jax.random.normal(ks[7], (1, cout), jnp.float32) * 0.05,
    }


if __name__ == "__main__":
    # in_ch=16, out_ch=32 (GroupNorm(8) needs out_ch % 8 == 0; in_ch != out_ch
    # so the residual path is a 1x1 conv, as in the module).
    B, L, cin, cout = 4, 16, 16, 32
    key = jax.random.PRNGKey(0)
    kx, ksk, kp = jax.random.split(key, 3)

    # layout: (B, L, Cin) for x, (B, 2L, Cin) for skip (channels-last)
    x = jax.random.normal(kx, (B, L, cin), jnp.float32)
    skip = jax.random.normal(ksk, (B, 2 * L, cin), jnp.float32)
    params = make_params(kp, cin, cout)

    out = jax.block_until_ready(decoder1d_pallas(x, skip, params))
    ref = jax.block_until_ready(decoder1d_ref(x, skip, params))

    assert out.shape == (B, 2 * L, cout), out.shape
    err = float(jnp.max(jnp.abs(out - ref)))
    assert jnp.allclose(out, ref, atol=1e-3, rtol=1e-3), f"max abs err {err}"
    print("KERNEL_OK")
</pallas_src>

<mosaic_0001>
module attributes {stable_mosaic.version = 11 : i64} {
  func.func @_decoder1d_kernel(%arg0: i32, %arg1: memref<32x16xf32, #tpu.memory_space<vmem>>, %arg2: memref<64x16xf32, #tpu.memory_space<vmem>>, %arg3: memref<64x32xf32, #tpu.memory_space<vmem>>, %arg4: memref<64x32xf32, #tpu.memory_space<vmem>>, %arg5: memref<16x256xf32, #tpu.memory_space<vmem>>, %arg6: memref<16x128xf32, #tpu.memory_space<vmem>>, %arg7: memref<1x128xf32, #tpu.memory_space<vmem>>, %arg8: memref<1x32xf32, #tpu.memory_space<vmem>>, %arg9: memref<1x32xf32, #tpu.memory_space<vmem>>, %arg10: memref<32x32xf32, #tpu.memory_space<vmem>>, %arg11: memref<16x128xf32, #tpu.memory_space<vmem>>) attributes {dimension_semantics = [#tpu.dimension_semantics<parallel>], iteration_bounds = array<i64: 2>, scalar_prefetch = 0 : i64, scratch_operands = 0 : i64, tpu.core_type = #tpu.core_type<tc>, window_params = [{transform_indices = @transform_0, window_bounds = array<i64: 32, 16>}, {transform_indices = @transform_1, window_bounds = array<i64: 64, 16>}, {pipeline_mode = #tpu.pipeline_mode<synchronous>, transform_indices = @transform_2, window_bounds = array<i64: 64, 32>}, {pipeline_mode = #tpu.pipeline_mode<synchronous>, transform_indices = @transform_3, window_bounds = array<i64: 64, 32>}, {pipeline_mode = #tpu.pipeline_mode<synchronous>, transform_indices = @transform_4, window_bounds = array<i64: 16, 256>}, {pipeline_mode = #tpu.pipeline_mode<synchronous>, transform_indices = @transform_5, window_bounds = array<i64: 16, 128>}, {pipeline_mode = #tpu.pipeline_mode<synchronous>, transform_indices = @transform_6, window_bounds = array<i64: 1, 128>}, {pipeline_mode = #tpu.pipeline_mode<synchronous>, transform_indices = @transform_7, window_bounds = array<i64: 1, 32>}, {pipeline_mode = #tpu.pipeline_mode<synchronous>, transform_indices = @transform_8, window_bounds = array<i64: 1, 32>}, {pipeline_mode = #tpu.pipeline_mode<synchronous>, transform_indices = @transform_9, window_bounds = array<i64: 32, 32>}, {transform_indices = @transform_10, window_bounds = array<i64: 16, 128>}]} {
    %c0 = arith.constant 0 : index
    %c0_0 = arith.constant 0 : index
    %0 = vector.load %arg2[%c0, %c0_0] : memref<64x16xf32, #tpu.memory_space<vmem>>, vector<64x16xf32>
    %c0_1 = arith.constant 0 : index
    %c0_2 = arith.constant 0 : index
    %1 = vector.load %arg1[%c0_1, %c0_2] : memref<32x16xf32, #tpu.memory_space<vmem>>, vector<32x16xf32>
    %c0_3 = arith.constant 0 : index
    %c0_4 = arith.constant 0 : index
    %2 = vector.load %arg5[%c0_3, %c0_4] : memref<16x256xf32, #tpu.memory_space<vmem>>, vector<16x256xf32>
    %cst = arith.constant dense<0.000000e+00> : vector<32x256xf32>
    %3 = tpu.matmul %1, %2, %cst {dimension_numbers = #tpu.dot_dimension_numbers<[1], [0], [0], [1], [0, 0, 1, 1], [], []>} : vector<32x16xf32>, vector<16x256xf32>, vector<32x256xf32> -> vector<32x256xf32>
    %4 = vector.extract_strided_slice %3 {offsets = [0, 0], sizes = [32, 128], strides = [1, 1]} : vector<32x256xf32> to vector<32x128xf32>
    %5 = vector.extract_strided_slice %3 {offsets = [0, 128], sizes = [32, 128], strides = [1, 1]} : vector<32x256xf32> to vector<32x128xf32>
    %6 = vector.shape_cast %4 : vector<32x128xf32> to vector<32x1x128xf32>
    %7 = vector.shape_cast %5 : vector<32x128xf32> to vector<32x1x128xf32>
    %8 = tpu.concatenate %6, %7 in 1 : vector<32x1x128xf32>, vector<32x1x128xf32> -> vector<32x2x128xf32>
    %9 = vector.shape_cast %8 : vector<32x2x128xf32> to vector<64x128xf32>
    %c0_5 = arith.constant 0 : index
    %c0_6 = arith.constant 0 : index
    %10 = vector.load %arg6[%c0_5, %c0_6] : memref<16x128xf32, #tpu.memory_space<vmem>>, vector<16x128xf32>
    %cst_7 = arith.constant dense<0.000000e+00> : vector<64x128xf32>
    %11 = tpu.matmul %0, %10, %cst_7 {dimension_numbers = #tpu.dot_dimension_numbers<[1], [0], [0], [1], [0, 0, 1, 1], [], []>} : vector<64x16xf32>, vector<16x128xf32>, vector<64x128xf32> -> vector<64x128xf32>
    %12 = arith.addf %9, %11 : vector<64x128xf32>
    %c0_8 = arith.constant 0 : index
    %c0_9 = arith.constant 0 : index
    %13 = vector.load %arg7[%c0_8, %c0_9] : memref<1x128xf32, #tpu.memory_space<vmem>>, vector<1x128xf32>
    %14 = vector.broadcast %13 : vector<1x128xf32> to vector<64x128xf32>
    %15 = arith.addf %12, %14 : vector<64x128xf32>
    %16 = vector.extract_strided_slice %15 {offsets = [0, 0], sizes = [64, 32], strides = [1, 1]} : vector<64x128xf32> to vector<64x32xf32>
    %17 = vector.extract_strided_slice %15 {offsets = [0, 32], sizes = [64, 32], strides = [1, 1]} : vector<64x128xf32> to vector<64x32xf32>
    %18 = vector.extract_strided_slice %15 {offsets = [0, 64], sizes = [64, 32], strides = [1, 1]} : vector<64x128xf32> to vector<64x32xf32>
    %19 = vector.extract_strided_slice %15 {offsets = [0, 96], sizes = [64, 32], strides = [1, 1]} : vector<64x128xf32> to vector<64x32xf32>
    %c0_10 = arith.constant 0 : index
    %c0_11 = arith.constant 0 : index
    %20 = vector.load %arg3[%c0_10, %c0_11] : memref<64x32xf32, #tpu.memory_space<vmem>>, vector<64x32xf32>
    %c1_i32 = arith.constant 1 : i32
    %21 = tpu.dynamic_rotate %16 by %c1_i32 dim 0 : vector<64x32xf32>, i32 -> vector<64x32xf32>
    %22 = arith.mulf %20, %21 : vector<64x32xf32>
    %c0_12 = arith.constant 0 : index
    %c0_13 = arith.constant 0 : index
    %23 = vector.load %arg4[%c0_12, %c0_13] : memref<64x32xf32, #tpu.memory_space<vmem>>, vector<64x32xf32>
    %c63_i32 = arith.constant 63 : i32
    %24 = tpu.dynamic_rotate %18 by %c63_i32 dim 0 : vector<64x32xf32>, i32 -> vector<64x32xf32>
    %25 = arith.mulf %23, %24 : vector<64x32xf32>
    %26 = arith.addf %22, %17 : vector<64x32xf32>
    %27 = arith.addf %26, %25 : vector<64x32xf32>
    %28 = vector.shape_cast %27 : vector<64x32xf32> to vector<2x32x32xf32>
    %cst_14 = arith.constant dense<0.000000e+00> : vector<2x32xf32>
    %29 = vector.multi_reduction <add>, %28, %cst_14 [1] : vector<2x32x32xf32> to vector<2x32xf32>
    %30 = arith.mulf %28, %28 : vector<2x32x32xf32>
    %cst_15 = arith.constant dense<0.000000e+00> : vector<2x32xf32>
    %31 = vector.multi_reduction <add>, %30, %cst_15 [1] : vector<2x32x32xf32> to vector<2x32xf32>
    %c0_16 = arith.constant 0 : index
    %c0_17 = arith.constant 0 : index
    %32 = vector.load %arg10[%c0_16, %c0_17] : memref<32x32xf32, #tpu.memory_space<vmem>>, vector<32x32xf32>
    %cst_18 = arith.constant dense<0.000000e+00> : vector<2x32xf32>
    %33 = tpu.matmul %29, %32, %cst_18 {dimension_numbers = #tpu.dot_dimension_numbers<[1], [0], [0], [1], [0, 0, 1, 1], [], []>} : vector<2x32xf32>, vector<32x32xf32>, vector<2x32xf32> -> vector<2x32xf32>
    %cst_19 = arith.constant 7.812500e-03 : f32
    %34 = vector.broadcast %cst_19 : f32 to vector<2x32xf32>
    %35 = arith.mulf %33, %34 : vector<2x32xf32>
    %c0_20 = arith.constant 0 : index
    %c0_21 = arith.constant 0 : index
    %36 = vector.load %arg10[%c0_20, %c0_21] : memref<32x32xf32, #tpu.memory_space<vmem>>, vector<32x32xf32>
    %cst_22 = arith.constant dense<0.000000e+00> : vector<2x32xf32>
    %37 = tpu.matmul %31, %36, %cst_22 {dimension_numbers = #tpu.dot_dimension_numbers<[1], [0], [0], [1], [0, 0, 1, 1], [], []>} : vector<2x32xf32>, vector<32x32xf32>, vector<2x32xf32> -> vector<2x32xf32>
    %cst_23 = arith.constant 7.812500e-03 : f32
    %38 = vector.broadcast %cst_23 : f32 to vector<2x32xf32>
    %39 = arith.mulf %37, %38 : vector<2x32xf32>
    %40 = arith.mulf %35, %35 : vector<2x32xf32>
    %41 = arith.subf %39, %40 : vector<2x32xf32>
    %cst_24 = arith.constant 0.000000e+00 : f32
    %42 = vector.broadcast %cst_24 : f32 to vector<2x32xf32>
    %43 = arith.maximumf %41, %42 : vector<2x32xf32>
    %cst_25 = arith.constant 9.99999974E-6 : f32
    %44 = vector.broadcast %cst_25 : f32 to vector<2x32xf32>
    %45 = arith.addf %43, %44 : vector<2x32xf32>
    %46 = math.rsqrt %45 : vector<2x32xf32>
    %c0_26 = arith.constant 0 : index
    %c0_27 = arith.constant 0 : index
    %47 = vector.load %arg8[%c0_26, %c0_27] : memref<1x32xf32, #tpu.memory_space<vmem>>, vector<1x32xf32>
    %48 = vector.broadcast %47 : vector<1x32xf32> to vector<2x32xf32>
    %49 = arith.mulf %46, %48 : vector<2x32xf32>
    %c0_28 = arith.constant 0 : index
    %c0_29 = arith.constant 0 : index
    %50 = vector.load %arg9[%c0_28, %c0_29] : memref<1x32xf32, #tpu.memory_space<vmem>>, vector<1x32xf32>
    %51 = arith.mulf %35, %49 : vector<2x32xf32>
    %52 = vector.broadcast %50 : vector<1x32xf32> to vector<2x32xf32>
    %53 = arith.subf %52, %51 : vector<2x32xf32>
    %54 = vector.shape_cast %49 : vector<2x32xf32> to vector<2x1x32xf32>
    %55 = vector.shape_cast %54 : vector<2x1x32xf32> to vector<2x1x32xf32>
    %56 = vector.broadcast %55 : vector<2x1x32xf32> to vector<2x32x32xf32>
    %57 = vector.shape_cast %56 : vector<2x32x32xf32> to vector<64x32xf32>
    %58 = vector.shape_cast %53 : vector<2x32xf32> to vector<2x1x32xf32>
    %59 = vector.shape_cast %58 : vector<2x1x32xf32> to vector<2x1x32xf32>
    %60 = vector.broadcast %59 : vector<2x1x32xf32> to vector<2x32x32xf32>
    %61 = vector.shape_cast %60 : vector<2x32x32xf32> to vector<64x32xf32>
    %62 = arith.mulf %27, %57 : vector<64x32xf32>
    %63 = arith.addf %62, %61 : vector<64x32xf32>
    %cst_30 = arith.constant 5.000000e-01 : f32
    %64 = vector.broadcast %cst_30 : f32 to vector<64x32xf32>
    %65 = arith.mulf %64, %63 : vector<64x32xf32>
    %cst_31 = arith.constant 0.707106769 : f32
    %66 = vector.broadcast %cst_31 : f32 to vector<64x32xf32>
    %67 = arith.mulf %63, %66 : vector<64x32xf32>
    %68 = math.erf %67 : vector<64x32xf32>
    %cst_32 = arith.constant 1.000000e+00 : f32
    %69 = vector.broadcast %cst_32 : f32 to vector<64x32xf32>
    %70 = arith.addf %69, %68 : vector<64x32xf32>
    %71 = arith.mulf %65, %70 : vector<64x32xf32>
    %72 = arith.addf %71, %19 : vector<64x32xf32>
    %73 = vector.shape_cast %72 : vector<64x32xf32> to vector<16x128xf32>
    %c0_33 = arith.constant 0 : index
    %c0_34 = arith.constant 0 : index
    %74 = vector.load %arg11[%c0_33, %c0_34] : memref<16x128xf32, #tpu.memory_space<vmem>>, vector<16x128xf32>
    tpu.vector_store %arg11[%c0_33, %c0_34], %73 {strides = array<i32>} : memref<16x128xf32, #tpu.memory_space<vmem>>, vector<16x128xf32>,
    return
  }
  func.func @transform_0(%arg0: i32) -> (i32, i32) {
    %c0_i32 = arith.constant 0 : i32
    %c0_i32_0 = arith.constant 0 : i32
    return %arg0, %c0_i32 : i32, i32
  }
  func.func @transform_1(%arg0: i32) -> (i32, i32) {
    %c0_i32 = arith.constant 0 : i32
    %c0_i32_0 = arith.constant 0 : i32
    return %arg0, %c0_i32 : i32, i32
  }
  func.func @transform_2(%arg0: i32) -> (i32, i32) {
    %c0_i32 = arith.constant 0 : i32
    %c0_i32_0 = arith.constant 0 : i32
    %c0_i32_1 = arith.constant 0 : i32
    return %c0_i32, %c0_i32_0 : i32, i32
  }
  func.func @transform_3(%arg0: i32) -> (i32, i32) {
    %c0_i32 = arith.constant 0 : i32
    %c0_i32_0 = arith.constant 0 : i32
    %c0_i32_1 = arith.constant 0 : i32
    return %c0_i32, %c0_i32_0 : i32, i32
  }
  func.func @transform_4(%arg0: i32) -> (i32, i32) {
    %c0_i32 = arith.constant 0 : i32
    %c0_i32_0 = arith.constant 0 : i32
    %c0_i32_1 = arith.constant 0 : i32
    return %c0_i32, %c0_i32_0 : i32, i32
  }
  func.func @transform_5(%arg0: i32) -> (i32, i32) {
    %c0_i32 = arith.constant 0 : i32
    %c0_i32_0 = arith.constant 0 : i32
    %c0_i32_1 = arith.constant 0 : i32
    return %c0_i32, %c0_i32_0 : i32, i32
  }
  func.func @transform_6(%arg0: i32) -> (i32, i32) {
    %c0_i32 = arith.constant 0 : i32
    %c0_i32_0 = arith.constant 0 : i32
    %c0_i32_1 = arith.constant 0 : i32
    return %c0_i32, %c0_i32_0 : i32, i32
  }
  func.func @transform_7(%arg0: i32) -> (i32, i32) {
    %c0_i32 = arith.constant 0 : i32
    %c0_i32_0 = arith.constant 0 : i32
    %c0_i32_1 = arith.constant 0 : i32
    return %c0_i32, %c0_i32_0 : i32, i32
  }
  func.func @transform_8(%arg0: i32) -> (i32, i32) {
    %c0_i32 = arith.constant 0 : i32
    %c0_i32_0 = arith.constant 0 : i32
    %c0_i32_1 = arith.constant 0 : i32
    return %c0_i32, %c0_i32_0 : i32, i32
  }
  func.func @transform_9(%arg0: i32) -> (i32, i32) {
    %c0_i32 = arith.constant 0 : i32
    %c0_i32_0 = arith.constant 0 : i32
    %c0_i32_1 = arith.constant 0 : i32
    return %c0_i32, %c0_i32_0 : i32, i32
  }
  func.func @transform_10(%arg0: i32) -> (i32, i32) {
    %c0_i32 = arith.constant 0 : i32
    %c0_i32_0 = arith.constant 0 : i32
    return %arg0, %c0_i32 : i32, i32
  }
}

module attributes {stable_mosaic.version = 11 : i64} {
  func.func @_decoder1d_kernel(%arg0: i32, %arg1: memref<32x16xf32, #tpu.memory_space<vmem>>, %arg2: memref<64x16xf32, #tpu.memory_space<vmem>>, %arg3: memref<64x32xf32, #tpu.memory_space<vmem>>, %arg4: memref<64x32xf32, #tpu.memory_space<vmem>>, %arg5: memref<16x256xf32, #tpu.memory_space<vmem>>, %arg6: memref<16x128xf32, #tpu.memory_space<vmem>>, %arg7: memref<1x128xf32, #tpu.memory_space<vmem>>, %arg8: memref<1x32xf32, #tpu.memory_space<vmem>>, %arg9: memref<1x32xf32, #tpu.memory_space<vmem>>, %arg10: memref<32x32xf32, #tpu.memory_space<vmem>>, %arg11: memref<64x32xf32, #tpu.memory_space<vmem>>) attributes {dimension_semantics = [#tpu.dimension_semantics<parallel>], iteration_bounds = array<i64: 2>, scalar_prefetch = 0 : i64, scratch_operands = 0 : i64, tpu.core_type = #tpu.core_type<tc>, window_params = [{transform_indices = @transform_0, window_bounds = array<i64: 32, 16>}, {transform_indices = @transform_1, window_bounds = array<i64: 64, 16>}, {pipeline_mode = #tpu.pipeline_mode<synchronous>, transform_indices = @transform_2, window_bounds = array<i64: 64, 32>}, {pipeline_mode = #tpu.pipeline_mode<synchronous>, transform_indices = @transform_3, window_bounds = array<i64: 64, 32>}, {pipeline_mode = #tpu.pipeline_mode<synchronous>, transform_indices = @transform_4, window_bounds = array<i64: 16, 256>}, {pipeline_mode = #tpu.pipeline_mode<synchronous>, transform_indices = @transform_5, window_bounds = array<i64: 16, 128>}, {pipeline_mode = #tpu.pipeline_mode<synchronous>, transform_indices = @transform_6, window_bounds = array<i64: 1, 128>}, {pipeline_mode = #tpu.pipeline_mode<synchronous>, transform_indices = @transform_7, window_bounds = array<i64: 1, 32>}, {pipeline_mode = #tpu.pipeline_mode<synchronous>, transform_indices = @transform_8, window_bounds = array<i64: 1, 32>}, {pipeline_mode = #tpu.pipeline_mode<synchronous>, transform_indices = @transform_9, window_bounds = array<i64: 32, 32>}, {transform_indices = @transform_10, window_bounds = array<i64: 64, 32>}]} {
    %c0 = arith.constant 0 : index
    %c0_0 = arith.constant 0 : index
    %0 = vector.load %arg2[%c0, %c0_0] : memref<64x16xf32, #tpu.memory_space<vmem>>, vector<64x16xf32>
    %c0_1 = arith.constant 0 : index
    %c0_2 = arith.constant 0 : index
    %1 = vector.load %arg1[%c0_1, %c0_2] : memref<32x16xf32, #tpu.memory_space<vmem>>, vector<32x16xf32>
    %c0_3 = arith.constant 0 : index
    %c0_4 = arith.constant 0 : index
    %2 = vector.load %arg5[%c0_3, %c0_4] : memref<16x256xf32, #tpu.memory_space<vmem>>, vector<16x256xf32>
    %cst = arith.constant dense<0.000000e+00> : vector<32x256xf32>
    %3 = tpu.matmul %1, %2, %cst {dimension_numbers = #tpu.dot_dimension_numbers<[1], [0], [0], [1], [0, 0, 1, 1], [], []>} : vector<32x16xf32>, vector<16x256xf32>, vector<32x256xf32> -> vector<32x256xf32>
    %4 = vector.extract_strided_slice %3 {offsets = [0, 0], sizes = [32, 128], strides = [1, 1]} : vector<32x256xf32> to vector<32x128xf32>
    %5 = vector.extract_strided_slice %3 {offsets = [0, 128], sizes = [32, 128], strides = [1, 1]} : vector<32x256xf32> to vector<32x128xf32>
    %6 = vector.shape_cast %4 : vector<32x128xf32> to vector<32x1x128xf32>
    %7 = vector.shape_cast %5 : vector<32x128xf32> to vector<32x1x128xf32>
    %8 = tpu.concatenate %6, %7 in 1 : vector<32x1x128xf32>, vector<32x1x128xf32> -> vector<32x2x128xf32>
    %9 = vector.shape_cast %8 : vector<32x2x128xf32> to vector<64x128xf32>
    %c0_5 = arith.constant 0 : index
    %c0_6 = arith.constant 0 : index
    %10 = vector.load %arg6[%c0_5, %c0_6] : memref<16x128xf32, #tpu.memory_space<vmem>>, vector<16x128xf32>
    %cst_7 = arith.constant dense<0.000000e+00> : vector<64x128xf32>
    %11 = tpu.matmul %0, %10, %cst_7 {dimension_numbers = #tpu.dot_dimension_numbers<[1], [0], [0], [1], [0, 0, 1, 1], [], []>} : vector<64x16xf32>, vector<16x128xf32>, vector<64x128xf32> -> vector<64x128xf32>
    %12 = arith.addf %9, %11 : vector<64x128xf32>
    %c0_8 = arith.constant 0 : index
    %c0_9 = arith.constant 0 : index
    %13 = vector.load %arg7[%c0_8, %c0_9] : memref<1x128xf32, #tpu.memory_space<vmem>>, vector<1x128xf32>
    %14 = vector.broadcast %13 : vector<1x128xf32> to vector<64x128xf32>
    %15 = arith.addf %12, %14 : vector<64x128xf32>
    %16 = vector.extract_strided_slice %15 {offsets = [0, 0], sizes = [64, 32], strides = [1, 1]} : vector<64x128xf32> to vector<64x32xf32>
    %17 = vector.extract_strided_slice %15 {offsets = [0, 32], sizes = [64, 32], strides = [1, 1]} : vector<64x128xf32> to vector<64x32xf32>
    %18 = vector.extract_strided_slice %15 {offsets = [0, 64], sizes = [64, 32], strides = [1, 1]} : vector<64x128xf32> to vector<64x32xf32>
    %19 = vector.extract_strided_slice %15 {offsets = [0, 96], sizes = [64, 32], strides = [1, 1]} : vector<64x128xf32> to vector<64x32xf32>
    %c0_10 = arith.constant 0 : index
    %c0_11 = arith.constant 0 : index
    %20 = vector.load %arg3[%c0_10, %c0_11] : memref<64x32xf32, #tpu.memory_space<vmem>>, vector<64x32xf32>
    %c1_i32 = arith.constant 1 : i32
    %21 = tpu.dynamic_rotate %16 by %c1_i32 dim 0 : vector<64x32xf32>, i32 -> vector<64x32xf32>
    %22 = arith.mulf %20, %21 : vector<64x32xf32>
    %c0_12 = arith.constant 0 : index
    %c0_13 = arith.constant 0 : index
    %23 = vector.load %arg4[%c0_12, %c0_13] : memref<64x32xf32, #tpu.memory_space<vmem>>, vector<64x32xf32>
    %c63_i32 = arith.constant 63 : i32
    %24 = tpu.dynamic_rotate %18 by %c63_i32 dim 0 : vector<64x32xf32>, i32 -> vector<64x32xf32>
    %25 = arith.mulf %23, %24 : vector<64x32xf32>
    %26 = arith.addf %22, %17 : vector<64x32xf32>
    %27 = arith.addf %26, %25 : vector<64x32xf32>
    %28 = vector.shape_cast %27 : vector<64x32xf32> to vector<2x32x32xf32>
    %cst_14 = arith.constant dense<0.000000e+00> : vector<2x32xf32>
    %29 = vector.multi_reduction <add>, %28, %cst_14 [1] : vector<2x32x32xf32> to vector<2x32xf32>
    %30 = arith.mulf %28, %28 : vector<2x32x32xf32>
    %cst_15 = arith.constant dense<0.000000e+00> : vector<2x32xf32>
    %31 = vector.multi_reduction <add>, %30, %cst_15 [1] : vector<2x32x32xf32> to vector<2x32xf32>
    %c0_16 = arith.constant 0 : index
    %c0_17 = arith.constant 0 : index
    %32 = vector.load %arg10[%c0_16, %c0_17] : memref<32x32xf32, #tpu.memory_space<vmem>>, vector<32x32xf32>
    %cst_18 = arith.constant dense<0.000000e+00> : vector<2x32xf32>
    %33 = tpu.matmul %29, %32, %cst_18 {dimension_numbers = #tpu.dot_dimension_numbers<[1], [0], [0], [1], [0, 0, 1, 1], [], []>} : vector<2x32xf32>, vector<32x32xf32>, vector<2x32xf32> -> vector<2x32xf32>
    %cst_19 = arith.constant 7.812500e-03 : f32
    %34 = vector.broadcast %cst_19 : f32 to vector<2x32xf32>
    %35 = arith.mulf %33, %34 : vector<2x32xf32>
    %c0_20 = arith.constant 0 : index
    %c0_21 = arith.constant 0 : index
    %36 = vector.load %arg10[%c0_20, %c0_21] : memref<32x32xf32, #tpu.memory_space<vmem>>, vector<32x32xf32>
    %cst_22 = arith.constant dense<0.000000e+00> : vector<2x32xf32>
    %37 = tpu.matmul %31, %36, %cst_22 {dimension_numbers = #tpu.dot_dimension_numbers<[1], [0], [0], [1], [0, 0, 1, 1], [], []>} : vector<2x32xf32>, vector<32x32xf32>, vector<2x32xf32> -> vector<2x32xf32>
    %cst_23 = arith.constant 7.812500e-03 : f32
    %38 = vector.broadcast %cst_23 : f32 to vector<2x32xf32>
    %39 = arith.mulf %37, %38 : vector<2x32xf32>
    %40 = arith.mulf %35, %35 : vector<2x32xf32>
    %41 = arith.subf %39, %40 : vector<2x32xf32>
    %cst_24 = arith.constant 0.000000e+00 : f32
    %42 = vector.broadcast %cst_24 : f32 to vector<2x32xf32>
    %43 = arith.maximumf %41, %42 : vector<2x32xf32>
    %cst_25 = arith.constant 9.99999974E-6 : f32
    %44 = vector.broadcast %cst_25 : f32 to vector<2x32xf32>
    %45 = arith.addf %43, %44 : vector<2x32xf32>
    %46 = math.rsqrt %45 : vector<2x32xf32>
    %c0_26 = arith.constant 0 : index
    %c0_27 = arith.constant 0 : index
    %47 = vector.load %arg8[%c0_26, %c0_27] : memref<1x32xf32, #tpu.memory_space<vmem>>, vector<1x32xf32>
    %48 = vector.broadcast %47 : vector<1x32xf32> to vector<2x32xf32>
    %49 = arith.mulf %46, %48 : vector<2x32xf32>
    %c0_28 = arith.constant 0 : index
    %c0_29 = arith.constant 0 : index
    %50 = vector.load %arg9[%c0_28, %c0_29] : memref<1x32xf32, #tpu.memory_space<vmem>>, vector<1x32xf32>
    %51 = arith.mulf %35, %49 : vector<2x32xf32>
    %52 = vector.broadcast %50 : vector<1x32xf32> to vector<2x32xf32>
    %53 = arith.subf %52, %51 : vector<2x32xf32>
    %54 = vector.shape_cast %49 : vector<2x32xf32> to vector<2x1x32xf32>
    %55 = vector.shape_cast %54 : vector<2x1x32xf32> to vector<2x1x32xf32>
    %56 = vector.broadcast %55 : vector<2x1x32xf32> to vector<2x32x32xf32>
    %57 = vector.shape_cast %56 : vector<2x32x32xf32> to vector<64x32xf32>
    %58 = vector.shape_cast %53 : vector<2x32xf32> to vector<2x1x32xf32>
    %59 = vector.shape_cast %58 : vector<2x1x32xf32> to vector<2x1x32xf32>
    %60 = vector.broadcast %59 : vector<2x1x32xf32> to vector<2x32x32xf32>
    %61 = vector.shape_cast %60 : vector<2x32x32xf32> to vector<64x32xf32>
    %62 = arith.mulf %27, %57 : vector<64x32xf32>
    %63 = arith.addf %62, %61 : vector<64x32xf32>
    %cst_30 = arith.constant 5.000000e-01 : f32
    %64 = vector.broadcast %cst_30 : f32 to vector<64x32xf32>
    %65 = arith.mulf %64, %63 : vector<64x32xf32>
    %cst_31 = arith.constant 0.707106769 : f32
    %66 = vector.broadcast %cst_31 : f32 to vector<64x32xf32>
    %67 = arith.mulf %63, %66 : vector<64x32xf32>
    %68 = math.erf %67 : vector<64x32xf32>
    %cst_32 = arith.constant 1.000000e+00 : f32
    %69 = vector.broadcast %cst_32 : f32 to vector<64x32xf32>
    %70 = arith.addf %69, %68 : vector<64x32xf32>
    %71 = arith.mulf %65, %70 : vector<64x32xf32>
    %72 = arith.addf %71, %19 : vector<64x32xf32>
    %c0_33 = arith.constant 0 : index
    %c0_34 = arith.constant 0 : index
    %73 = vector.load %arg11[%c0_33, %c0_34] : memref<64x32xf32, #tpu.memory_space<vmem>>, vector<64x32xf32>
    tpu.vector_store %arg11[%c0_33, %c0_34], %72 {strides = array<i32>} : memref<64x32xf32, #tpu.memory_space<vmem>>, vector<64x32xf32>,
    return
  }
  func.func @transform_0(%arg0: i32) -> (i32, i32) {
    %c0_i32 = arith.constant 0 : i32
    %c0_i32_0 = arith.constant 0 : i32
    return %arg0, %c0_i32 : i32, i32
  }
  func.func @transform_1(%arg0: i32) -> (i32, i32) {
    %c0_i32 = arith.constant 0 : i32
    %c0_i32_0 = arith.constant 0 : i32
    return %arg0, %c0_i32 : i32, i32
  }
  func.func @transform_2(%arg0: i32) -> (i32, i32) {
    %c0_i32 = arith.constant 0 : i32
    %c0_i32_0 = arith.constant 0 : i32
    %c0_i32_1 = arith.constant 0 : i32
    return %c0_i32, %c0_i32_0 : i32, i32
  }
  func.func @transform_3(%arg0: i32) -> (i32, i32) {
    %c0_i32 = arith.constant 0 : i32
    %c0_i32_0 = arith.constant 0 : i32
    %c0_i32_1 = arith.constant 0 : i32
    return %c0_i32, %c0_i32_0 : i32, i32
  }
  func.func @transform_4(%arg0: i32) -> (i32, i32) {
    %c0_i32 = arith.constant 0 : i32
    %c0_i32_0 = arith.constant 0 : i32
    %c0_i32_1 = arith.constant 0 : i32
    return %c0_i32, %c0_i32_0 : i32, i32
  }
  func.func @transform_5(%arg0: i32) -> (i32, i32) {
    %c0_i32 = arith.constant 0 : i32
    %c0_i32_0 = arith.constant 0 : i32
    %c0_i32_1 = arith.constant 0 : i32
    return %c0_i32, %c0_i32_0 : i32, i32
  }
  func.func @transform_6(%arg0: i32) -> (i32, i32) {
    %c0_i32 = arith.constant 0 : i32
    %c0_i32_0 = arith.constant 0 : i32
    %c0_i32_1 = arith.constant 0 : i32
    return %c0_i32, %c0_i32_0 : i32, i32
  }
  func.func @transform_7(%arg0: i32) -> (i32, i32) {
    %c0_i32 = arith.constant 0 : i32
    %c0_i32_0 = arith.constant 0 : i32
    %c0_i32_1 = arith.constant 0 : i32
    return %c0_i32, %c0_i32_0 : i32, i32
  }
  func.func @transform_8(%arg0: i32) -> (i32, i32) {
    %c0_i32 = arith.constant 0 : i32
    %c0_i32_0 = arith.constant 0 : i32
    %c0_i32_1 = arith.constant 0 : i32
    return %c0_i32, %c0_i32_0 : i32, i32
  }
  func.func @transform_9(%arg0: i32) -> (i32, i32) {
    %c0_i32 = arith.constant 0 : i32
    %c0_i32_0 = arith.constant 0 : i32
    %c0_i32_1 = arith.constant 0 : i32
    return %c0_i32, %c0_i32_0 : i32, i32
  }
  func.func @transform_10(%arg0: i32) -> (i32, i32) {
    %c0_i32 = arith.constant 0 : i32
    %c0_i32_0 = arith.constant 0 : i32
    return %arg0, %c0_i32 : i32, i32
  }
}

</mosaic_0001>

<bundles_post_ra>
// kernel: tpu_custom_call.1
= control target key start
LH: loop header
LB: loop body
LE: loop exit
PB: predicated region body
PF: predicated region fallthrough
CT: control target
= control target key end

     0   :  { %s2495_s13 = smov 0   ;;  %s3240_s0 = inlined_call_operand.vmem [shape: f32[64,16], index: 0, kind: input, shape index: {}]   ;;  %s3241_s1 = inlined_call_operand.vmem [shape: f32[128,16], index: 1, kind: input, shape index: {}]   ;;  %s3242_s2 = inlined_call_operand.vmem [shape: f32[64,32], index: 2, kind: input, shape index: {}]   ;;  %s3243_s3 = inlined_call_operand.vmem [shape: f32[64,32], index: 3, kind: input, shape index: {}]   ;;  %s3244_s4 = inlined_call_operand.vmem [shape: f32[16,256], index: 4, kind: input, shape index: {}]   ;;  %s3245_s5 = inlined_call_operand.vmem [shape: f32[16,128], index: 5, kind: input, shape index: {}]   ;;  %s3246_s6 = inlined_call_operand.vmem [shape: f32[1,128], index: 6, kind: input, shape index: {}]   ;;  %s3247_s7 = inlined_call_operand.vmem [shape: f32[1,32], index: 7, kind: input, shape index: {}]   ;;  %s3248_s8 = inlined_call_operand.vmem [shape: f32[1,32], index: 8, kind: input, shape index: {}]   ;;  %s3249_s9 = inlined_call_operand.vmem [shape: f32[32,32], index: 9, kind: input, shape index: {}]   ;;  %s3250_s10 = inlined_call_operand.vmem [shape: f32[128,32], index: 10, kind: output, shape index: {}]  }
   0x1 LB: > { %s2304_s14 = sadd.s32 4294967295, %s2431_s13   ;;  %p2308_p0 = scmp.ge.s32.totalorder %s2431_s13, 1  ;;  %s2431_s13 = sphi %s2495_s13, %s20_s13  }
   0x2   : > { %p324_p1 = scmp.lt.s32.totalorder %s2431_s13, 3 }
   0x4   : > { %p325_p2 = pnand %p2308_p0, %p324_p1 }
   0x5   : > { %s2309_s21 = sshll.u32 (!%p325_p2), %s2304_s14, 2  ;;  %s2311_s28 = sshll.u32 (!%p325_p2), %s2304_s14, 3 }
   0x6   : > { %328 = sbr.rel (%p325_p2) target bundleno = 712 (0x2c8), region = 60  ;;  %p368_p3 = scmp.lt.s32.totalorder (!%p325_p2), %s2309_s21, 7 }
   0x7   : > { %p374_p4 = scmp.lt.s32.totalorder (!%p325_p2), %s2311_s28, 15  ;;  %s2436_s20 = smov (!%p325_p2), 64  }
   0x8   : > { %s2438_s22 = smov (!%p325_p2), 32  }
   0xb   : > { %v400_v0 = vld [vmem:[%s3244_s4 + $0x18] sm:$0xff]  ;;  %v399_v1 = vld [vmem:[%s3244_s4 + $0x10] sm:$0xff]  ;;  %v398_v2 = vld [vmem:[%s3244_s4 + $0x8] sm:$0xff]  ;;  %v3251_v4 = vmov 0.0   ;;  %s3263_s21 = smov (!%p368_p3, %s2309_s21), 7  ;;  %s3265_s28 = smov (!%p374_p4, %s2311_s28), 15  ;;  %v511_v23 = vlaneseq }
   0xc   : > { %442 = vmatprep.subr.mxu0 %v400_v0  ;;  %v397_v3 = vld [vmem:[%s3244_s4] sm:$0xff]  ;;  %478 = vmatprep.mubr.f32.mxu0 %v3251_v4  ;;  %v1129_v5 = vld [vmem:[%s3245_s5 + $0x8] sm:$0xff]  ;;  %s2310_s29 = sshll.u32 %s3263_s21, 3  ;;  %vm401_vm0 = vcmask 130048   ;;  %s2312_s14 = sshll.u32 %s3265_s28, 3  ;;  %vm1095_vm1 = vcmask 1040384  }
   0xd   : > { %v1128_v6 = vld [vmem:[%s3245_s5] sm:$0xff]  ;;  %443 = vmatpush1.msra.mxu0 %v399_v1  ;;  %2354 = vmatprep.subr.mxu1 %v1129_v5  ;;  %s371_s12 = scalar_lea.vmem %s3240_s0, %s2310_s29  ;;  %s377_s17 = scalar_lea.vmem %s3241_s1, %s2312_s14  ;;  %v2434_v19 = vmov 1983009808   ;;  %v2435_v21 = vmov 1966171168   ;;  %v2550_v26 = vshrl.u32 %v511_v23, 7 }
   0xe   : > { %444 = vmatprep.subr.mxu0 %v398_v2  ;;  %2355 = vmatpush3.msra.mxu1 %v1129_v5  ;;  %v393_v7 = vld [vmem:[%s371_s12] sm:$0xff]  ;;  %v386_v9 = vld [vmem:[%s377_s17 + $0x8] sm:$0xff]  ;;  %v387_v10 = vld [vmem:[%s377_s17 + $0x10] sm:$0xff]  ;;  %v1269_v20 = vunpack.c.l.s4 %v2434_v19  ;;  %v509_v22 = vunpack.c.l.s4 %v2435_v21  ;;  %s2437_s21 = smov 96   ;;  %vm2439_vm3 = vmmov 0   ;;  %vm1834_vm5 = vcmask 261120   ;;  %s3219_s18 = scalar_lea.vmem %s3250_s10, %s2312_s14 }
   0xf   : > { %445 = vmatpush1.msra.mxu0 %v397_v3  ;;  %2356 = vmatprep.subr.mxu1 %v1128_v6  ;;  %v385_v8 = vld [vmem:[%s377_s17] sm:$0xff]  ;;  %v394_v11 = vld [vmem:[%s371_s12 + $0x8] sm:$0xff]  ;;  %v388_v12 = vld [vmem:[%s377_s17 + $0x18] sm:$0xff]  ;;  %v2569_v37 = vsub.s32 0, %v2550_v26  ;;  %vm1720_vm2 = vcmp.lt.s32.totalorder %v2550_v26, 1  ;;  %vm1777_vm4 = vcmp.lt.s32.totalorder %v2550_v26, 7 }
  0x10   : > { %2357 = vmatpush3.msra.mxu1 %v1128_v6  ;;  %2370 = vmatprep.subr.mxu0 %v3251_v4  ;;  %v389_v13 = vld [vmem:[%s377_s17 + $0x20] sm:$0xff]  ;;  %v395_v14 = vld [vmem:[%s371_s12 + $0x10] sm:$0xff]  ;;  %v390_v15 = vld [vmem:[%s377_s17 + $0x28] sm:$0xff]  ;;  %v1270_v24 = vunpack.c.0.s8 %v1269_v20  ;;  %v510_v25 = vunpack.c.0.s8 %v509_v22  ;;  %vm1901_vm6 = vcmask 1041409  }
  0x11   : > { %2381 = vmatprep.subr.mxu1 %v3251_v4  ;;  %2315 = vmatmul.mubr.msk.f32.vlgmr.msra.gmra.mxu0 %vm401_vm0, %v393_v7  ;;  %v391_v16 = vld [vmem:[%s377_s17 + $0x30] sm:$0xff]  ;;  %v396_v17 = vld [vmem:[%s371_s12 + $0x18] sm:$0xff]  ;;  %v2327_v27 = vld [vmem:[%s3246_s6] ss:$0 sm:$0xff] }
  0x12   : > { %484 = vmatprep.mubr.f32.mxu0 %v3251_v4  ;;  %2358 = vmatprep.mubr.msk.f32.mxu1 %vm401_vm0, %v385_v8  ;;  %v392_v18 = vld [vmem:[%s377_s17 + $0x38] sm:$0xff]  ;;  %v2556_v28 = vsub.s32 %v1270_v24, %v2550_v26  ;;  %v1473_v29 = vcombine.high %v2327_v27, %v2327_v27  ;;  %v2559_v30 = vsub.s32 %v510_v25, %v2550_v26 }
  0x13   : > { %2359 = vmatmul.mubr.msk.f32.vlgmr.msra.gmra.mxu1 %vm401_vm0, %v386_v9  ;;  %v1744_v26 = vld [vmem:[%s3243_s3 + $0x38] sm:$0xff] }
  0x14   : > { %2361 = vmatprep.mubr.msk.f32.mxu1 %vm401_vm0, %v387_v10  ;;  %v2562_v31 = vrot.slane %v2327_v27, %v2556_v28  ;;  %v2565_v33 = vrot.slane %v1473_v29, %v2556_v28 }
  0x15   : > { %2316 = vmatmul.mubr.msk.f32.gmra.mxu0 %vm401_vm0, %v394_v11 }
  0x16   : > { %490 = vmatprep.mubr.f32.mxu0 %v3251_v4  ;;  %v2573_v38 = vcombine.high %v2562_v31, %v2562_v31  ;;  %v2583_v47 = vcombine.high %v2565_v33, %v2565_v33 }
  0x17   : > { %2362 = vmatmul.mubr.msk.f32.gmra.mxu1 %vm401_vm0, %v388_v12 }
  0x18   : > { %2364 = vmatprep.mubr.msk.f32.mxu1 %vm401_vm0, %v389_v13 }
  0x19   : > { %2317 = vmatmul.mubr.msk.f32.gmra.mxu0 %vm401_vm0, %v395_v14 }
  0x1a   : > { %496 = vmatprep.mubr.f32.mxu0 %v3251_v4 }
  0x1b   : > { %2365 = vmatmul.mubr.msk.f32.gmra.mxu1 %vm401_vm0, %v390_v15 }
  0x1c   : > { %2367 = vmatprep.mubr.msk.f32.mxu1 %vm401_vm0, %v391_v16 }
  0x1d   : > { %2318 = vmatmul.mubr.msk.f32.gmra.mxu0 %vm401_vm0, %v396_v17 }
  0x1f   : > { %2368 = vmatmul.mubr.msk.f32.gmra.mxu1 %vm401_vm0, %v392_v18 }
  0xd1   : > { %v480_v32 = vpop.f32.mrf.mxu0 }
  0xd2   : > { %v507_v34 = vcombine.high %v480_v32, %v480_v32  ;;  %v514_v35 = vrot.slane %v480_v32, %v2559_v30 }
  0xd3   : > { %v482_v36 = vpop.f32.mrf.mxu0  ;;  %v2360_v43 = vpop.f32.mrf.mxu1 }
  0xd4   : > { %v521_v39 = vrot.slane %v507_v34, %v2559_v30  ;;  %v522_v40 = vcombine.high %v514_v35, %v514_v35  ;;  %v2577_v41 = vrot.slane %v514_v35, %v2559_v30  ;;  %v739_v42 = vcombine.high %v482_v36, %v482_v36 }
  0xd5   : > { %v746_v44 = vrot.slane %v482_v36, %v2559_v30  ;;  %v1284_v45 = vcombine.high %v2360_v43, %v2360_v43  ;;  %v1291_v46 = vrot.slane %v2360_v43, %v2556_v28  ;;  %v486_v52 = vpop.f32.mrf.mxu0 }
  0xd6   : > { %v523_v48 = vcombine.high %v521_v39, %v521_v39  ;;  %v537_v49 = vrot.slane %v521_v39, %v2559_v30  ;;  %v2587_v50 = vrot.slane %v522_v40, %v2559_v30  ;;  %v552_v51 = vcombine.high %v2577_v41, %v2577_v41 }
  0xd7   : > { %v753_v53 = vrot.slane %v739_v42, %v2559_v30  ;;  %v754_v54 = vcombine.high %v746_v44, %v746_v44  ;;  %v762_v55 = vrot.slane %v746_v44, %v2559_v30  ;;  %v556_v56 = vcombine.high %v486_v52, %v486_v52  ;;  %v488_v22 = vpop.f32.mrf.mxu0 }
  0xd8   : > { %v551_v57 = vrot.slane %v523_v48, %v2559_v30  ;;  %v553_v58 = vcombine.high %v537_v49, %v537_v49  ;;  %v554_v59 = vcombine.high %v2587_v50, %v2587_v50  ;;  %v563_v60 = vrot.slane %v486_v52, %v2559_v30 }
  0xd9   : > { %v755_v61 = vcombine.high %v753_v53, %v753_v53  ;;  %v769_v62 = vrot.slane %v753_v53, %v2559_v30  ;;  %v776_v63 = vrot.slane %v754_v54, %v2559_v30  ;;  %v784_v0 = vcombine.high %v762_v55, %v762_v55 }
  0xda   : > { %v555_v1 = vcombine.high %v551_v57, %v551_v57  ;;  %v938_v2 = vrot.slane %v762_v55, %v2569_v37  ;;  %v570_v3 = vrot.slane %v556_v56, %v2559_v30  ;;  %v571_v5 = vcombine.high %v563_v60, %v563_v60 }
  0xdb   : > { %v783_v6 = vrot.slane %v755_v61, %v2559_v30  ;;  %v785_v7 = vcombine.high %v769_v62, %v769_v62  ;;  %v786_v8 = vcombine.high %v776_v63, %v776_v63  ;;  %v942_v9 = vrot.slane %v776_v63, %v2569_v37 }
  0xdc   : > { %v946_v10 = vrot.slane %v784_v0, %v2569_v37  ;;  %v954_v11 = vrot.slane %v769_v62, %v2569_v37  ;;  %v572_v12 = vcombine.high %v570_v3, %v570_v3  ;;  %v2606_v13 = vrot.slane %v563_v60, %v2559_v30 }
  0xdd   : > { %v787_v14 = vcombine.high %v783_v6, %v783_v6  ;;  %v950_v15 = vrot.slane %v786_v8, %v2569_v37  ;;  %v958_v16 = vrot.slane %v783_v6, %v2569_v37  ;;  %v962_v17 = vrot.slane %v785_v7, %v2569_v37  ;;  %v1220_v6 = vpop.f32.mrf.mxu1 }
  0xde   : > { %v2612_v18 = vrot.slane %v570_v3, %v2559_v30  ;;  %v2615_v19 = vrot.slane %v571_v5, %v2559_v30  ;;  %v2618_v20 = vrot.slane %v572_v12, %v2559_v30  ;;  %v601_v21 = vcombine.high %v2606_v13, %v2606_v13 }
  0xdf   : > { %v966_v23 = vrot.slane %v787_v14, %v2569_v37  ;;  %v1100_v24 = vsel %vm1095_vm1, %v537_v49, %v954_v11  ;;  %v1101_v25 = vsel %vm1095_vm1, %v551_v57, %v958_v16  ;;  %v1102_v27 = vsel %vm1095_vm1, %v553_v58, %v962_v17  ;;  %v492_v17 = vpop.f32.mrf.mxu0 }
  0xe0   : > { %v602_v29 = vcombine.high %v2612_v18, %v2612_v18  ;;  %v603_v32 = vcombine.high %v2615_v19, %v2615_v19  ;;  %v604_v34 = vcombine.high %v2618_v20, %v2618_v20  ;;  %v1298_v35 = vrot.slane %v1284_v45, %v2556_v28 }
  0xe1   : > { %v1103_v36 = vsel %vm1095_vm1, %v555_v1, %v966_v23  ;;  %v1299_v39 = vcombine.high %v1291_v46, %v1291_v46  ;;  %v1439_v40 = vadd.f32 %v1291_v46, %v1100_v24  ;;  %v788_v42 = vcombine.high %v488_v22, %v488_v22 }
  0xe2   : > { %v1300_v43 = vcombine.high %v1298_v35, %v1298_v35  ;;  %v1441_v44 = vadd.f32 %v1298_v35, %v1102_v27  ;;  %v795_v48 = vrot.slane %v488_v22, %v2559_v30  ;;  %v1096_v49 = vsel %vm1095_vm1, %v2577_v41, %v938_v2 }
  0xe3   : > { %v1440_v52 = vadd.f32 %v1299_v39, %v1101_v25  ;;  %v2638_v53 = vadd.f32 %v2562_v31, %v1439_v40  ;;  %v802_v54 = vrot.slane %v788_v42, %v2559_v30  ;;  %v1097_v45 = vsel %vm1095_vm1, %v2587_v50, %v942_v9 }
  0xe4   : > { %v1442_v55 = vadd.f32 %v1300_v43, %v1103_v36  ;;  %v2644_v46 = vadd.f32 %v2565_v33, %v1441_v44  ;;  %v803_v56 = vcombine.high %v795_v48, %v795_v48  ;;  %v2647_v57 = vrot.slane %v795_v48, %v2559_v30 }
  0xe5   : > { %v2650_v58 = vadd.f32 %v2573_v38, %v1440_v52  ;;  %v804_v60 = vcombine.high %v802_v54, %v802_v54  ;;  %v818_v61 = vrot.slane %v802_v54, %v2559_v30  ;;  %v1098_v62 = vsel %vm1095_vm1, %v552_v51, %v946_v10 }
  0xe6   : > { %v2658_v63 = vadd.f32 %v2583_v47, %v1442_v55  ;;  %v2661_v0 = vrot.slane %v803_v56, %v2559_v30  ;;  %v833_v1 = vcombine.high %v2647_v57, %v2647_v57  ;;  %v970_v2 = vrot.slane %v2647_v57, %v2569_v37 }
  0xe7   : > { %v832_v5 = vrot.slane %v804_v60, %v2559_v30  ;;  %v834_v41 = vcombine.high %v818_v61, %v818_v61  ;;  %v986_v51 = vrot.slane %v818_v61, %v2569_v37  ;;  %v1099_v16 = vsel %vm1095_vm1, %v554_v59, %v950_v15  ;;  %v2363_v61 = vpop.f32.mrf.mxu1 }
  0xe8   : > { %v835_v8 = vcombine.high %v2661_v0, %v2661_v0  ;;  %v974_v9 = vrot.slane %v2661_v0, %v2569_v37  ;;  %v2678_v10 = vrot.slane %v833_v1, %v2569_v37  ;;  %v1267_v23 = vcombine.high %v1220_v6, %v1220_v6 }
  0xe9   : > { %v836_v11 = vcombine.high %v832_v5, %v832_v5  ;;  %v990_v12 = vrot.slane %v832_v5, %v2569_v37  ;;  %v994_v14 = vrot.slane %v834_v41, %v2569_v37  ;;  %v1274_v24 = vrot.slane %v1220_v6, %v2556_v28 }
  0xea   : > { %v2687_v22 = vrot.slane %v835_v8, %v2569_v37  ;;  %v605_v25 = vcombine.high %v492_v17, %v492_v17  ;;  %v612_v35 = vrot.slane %v492_v17, %v2559_v30  ;;  %v1108_v36 = vsel %vm1095_vm1, %v2612_v18, %v986_v51 }
  0xeb   : > { %v998_v27 = vrot.slane %v836_v11, %v2569_v37  ;;  %v1109_v50 = vsel %vm1095_vm1, %v2618_v20, %v990_v12  ;;  %v1281_v59 = vrot.slane %v1267_v23, %v2556_v28  ;;  %v1282_v15 = vcombine.high %v1274_v24, %v1274_v24 }
  0xec   : > { %v1435_v39 = vadd.f32 %v1274_v24, %v1096_v49  ;;  %v619_v40 = vrot.slane %v605_v25, %v2559_v30  ;;  %v620_v42 = vcombine.high %v612_v35, %v612_v35  ;;  %v2699_v43 = vrot.slane %v612_v35, %v2559_v30 }
  0xed   : > { %v1110_v44 = vsel %vm1095_vm1, %v602_v29, %v994_v14  ;;  %v1111_v48 = vsel %vm1095_vm1, %v604_v34, %v998_v27  ;;  %v1283_v52 = vcombine.high %v1281_v59, %v1281_v59  ;;  %v1436_v54 = vadd.f32 %v1282_v15, %v1097_v45  ;;  %v494_v29 = vpop.f32.mrf.mxu0 }
  0xee   : > { %v1437_v18 = vadd.f32 %v1281_v59, %v1098_v62  ;;  %v2704_v55 = vadd.f32 %v2562_v31, %v1435_v39  ;;  %v621_v20 = vcombine.high %v619_v40, %v619_v40  ;;  %v2707_v56 = vrot.slane %v619_v40, %v2559_v30 }
  0xef   : > { %v2710_v49 = vrot.slane %v620_v42, %v2559_v30  ;;  %v650_v60 = vcombine.high %v2699_v43, %v2699_v43  ;;  %v1438_v1 = vadd.f32 %v1283_v52, %v1099_v16  ;;  %v2715_v34 = vadd.f32 %v2573_v38, %v1436_v54 }
  0xf0   : > { %v2718_v45 = vadd.f32 %v2565_v33, %v1437_v18  ;;  %v1318_v62 = vcombine.high %v2363_v61, %v2363_v61  ;;  %v2721_v5 = vrot.slane %v621_v20, %v2559_v30  ;;  %v651_v41 = vcombine.high %v2707_v56, %v2707_v56 }
  0xf1   : > { %v652_v51 = vcombine.high %v2710_v49, %v2710_v49  ;;  %v1325_v6 = vrot.slane %v2363_v61, %v2556_v28  ;;  %v2729_v8 = vadd.f32 %v2583_v47, %v1438_v1  ;;  %v1566_v11 = vcombine.low %v2704_v55, %v2715_v34 }
  0xf2   : > { %v1332_v12 = vrot.slane %v1318_v62, %v2556_v28  ;;  %v837_v14 = vcombine.high %v494_v29, %v494_v29  ;;  %v653_v16 = vcombine.high %v2721_v5, %v2721_v5  ;;  %v844_v24 = vrot.slane %v494_v29, %v2559_v30 }
  0xf3   : > { %v1333_v17 = vcombine.high %v1325_v6, %v1325_v6  ;;  %v1447_v23 = vadd.f32 %v1325_v6, %v1108_v36  ;;  %v1107_v57 = vsel %vm1095_vm1, %v603_v32, %v2687_v22 }
  0xf4   : > { %v1334_v27 = vcombine.high %v1332_v12, %v1332_v12  ;;  %v1449_v35 = vadd.f32 %v1332_v12, %v1110_v44  ;;  %v851_v59 = vrot.slane %v837_v14, %v2559_v30  ;;  %v852_v40 = vcombine.high %v844_v24, %v844_v24 }
  0xf5   : > { %v1448_v15 = vadd.f32 %v1333_v17, %v1109_v50  ;;  %v2741_v39 = vadd.f32 %v2562_v31, %v1447_v23  ;;  %v2744_v42 = vrot.slane %v844_v24, %v2559_v30  ;;  %v1230_v23 = vpop.f32.mrf.mxu1 }
  0xf6   : > { %v1450_v52 = vadd.f32 %v1334_v27, %v1111_v48  ;;  %v2747_v36 = vadd.f32 %v2565_v33, %v1449_v35  ;;  %v853_v54 = vcombine.high %v851_v59, %v851_v59  ;;  %v867_v18 = vrot.slane %v851_v59, %v2559_v30 }
  0xf7   : > { %v2751_v20 = vadd.f32 %v2573_v38, %v1448_v15  ;;  %v2754_v44 = vrot.slane %v852_v40, %v2559_v30  ;;  %v882_v50 = vcombine.high %v2744_v42, %v2744_v42  ;;  %v1002_v61 = vrot.slane %v2744_v42, %v2569_v37 }
  0xf8   : > { %v2761_v48 = vadd.f32 %v2583_v47, %v1450_v52  ;;  %v881_v29 = vrot.slane %v853_v54, %v2559_v30  ;;  %v883_v1 = vcombine.high %v867_v18, %v867_v18  ;;  %v1018_v62 = vrot.slane %v867_v18, %v2569_v37 }
  0xf9   : > { %v884_v12 = vcombine.high %v2754_v44, %v2754_v44  ;;  %v1006_v14 = vrot.slane %v2754_v44, %v2569_v37  ;;  %v2772_v17 = vrot.slane %v882_v50, %v2569_v37  ;;  %v1104_v40 = vsel %vm1095_vm1, %v2606_v13, %v970_v2  ;;  %v498_v50 = vpop.f32.mrf.mxu0 }
  0xfa   : > { %v885_v27 = vcombine.high %v881_v29, %v881_v29  ;;  %v1022_v35 = vrot.slane %v881_v29, %v2569_v37  ;;  %v1026_v59 = vrot.slane %v883_v1, %v2569_v37  ;;  %v1105_v52 = vsel %vm1095_vm1, %v2615_v19, %v974_v9 }
  0xfb   : > { %v2779_v15 = vrot.slane %v884_v12, %v2569_v37  ;;  %v1106_v54 = vsel %vm1095_vm1, %v601_v21, %v2678_v10  ;;  %v1301_v2 = vcombine.high %v1230_v23, %v1230_v23  ;;  %v1308_v0 = vrot.slane %v1230_v23, %v2556_v28 }
  0xfc   : > { %v1030_v18 = vrot.slane %v885_v27, %v2569_v37  ;;  %v654_v29 = vcombine.high %v498_v50, %v498_v50  ;;  %v661_v9 = vrot.slane %v498_v50, %v2559_v30  ;;  %v1116_v13 = vsel %vm1095_vm1, %v2707_v56, %v1018_v62 }
  0xfd   : > { %v1117_v21 = vsel %vm1095_vm1, %v2721_v5, %v1022_v35  ;;  %v1315_v10 = vrot.slane %v1301_v2, %v2556_v28  ;;  %v1316_v1 = vcombine.high %v1308_v0, %v1308_v0  ;;  %v1443_v12 = vadd.f32 %v1308_v0, %v1104_v40  ;;  %v2366_v40 = vpop.f32.mrf.mxu1  ;;  %v500_v2 = vpop.f32.mrf.mxu0 }
  0xfe   : > { %v1118_v19 = vsel %vm1095_vm1, %v651_v41, %v1026_v59  ;;  %v668_v32 = vrot.slane %v654_v29, %v2559_v30  ;;  %v669_v22 = vcombine.high %v661_v9, %v661_v9  ;;  %v2812_v23 = vrot.slane %v661_v9, %v2559_v30 }
  0xff   : > { %v1119_v27 = vsel %vm1095_vm1, %v653_v16, %v1030_v18  ;;  %v1317_v50 = vcombine.high %v1315_v10, %v1315_v10  ;;  %v1444_v4 = vadd.f32 %v1316_v1, %v1105_v52  ;;  %v1445_v56 = vadd.f32 %v1315_v10, %v1106_v54 }
 0x100   : > { %v2816_v62 = vadd.f32 %v2562_v31, %v1443_v12  ;;  %v670_v5 = vcombine.high %v668_v32, %v668_v32  ;;  %v2819_v35 = vrot.slane %v668_v32, %v2559_v30  ;;  %v2822_v41 = vrot.slane %v669_v22, %v2559_v30 }
 0x101   : > { %v699_v59 = vcombine.high %v2812_v23, %v2812_v23  ;;  %v1446_v0 = vadd.f32 %v1317_v50, %v1107_v57  ;;  %v2827_v16 = vadd.f32 %v2573_v38, %v1444_v4  ;;  %v2830_v52 = vadd.f32 %v2565_v33, %v1445_v56 }
 0x102   : > { %v1352_v54 = vcombine.high %v2366_v40, %v2366_v40  ;;  %v698_v18 = vrot.slane %v670_v5, %v2559_v30  ;;  %v700_v29 = vcombine.high %v2819_v35, %v2819_v35  ;;  %v701_v9 = vcombine.high %v2822_v41, %v2822_v41 }
 0x103   : > { %v1359_v10 = vrot.slane %v2366_v40, %v2556_v28  ;;  %v2839_v1 = vadd.f32 %v2583_v47, %v1446_v0  ;;  %v886_v12 = vcombine.high %v500_v2, %v500_v2  ;;  %v893_v56 = vrot.slane %v500_v2, %v2559_v30 }
 0x104   : > { %v1366_v57 = vrot.slane %v1352_v54, %v2556_v28  ;;  %v702_v32 = vcombine.high %v698_v18, %v698_v18  ;;  %v1115_v42 = vsel %vm1095_vm1, %v652_v51, %v2779_v15 }
 0x105   : > { %v1367_v22 = vcombine.high %v1359_v10, %v1359_v10  ;;  %v1455_v50 = vadd.f32 %v1359_v10, %v1116_v13  ;;  %v900_v40 = vrot.slane %v886_v12, %v2559_v30  ;;  %v901_v4 = vcombine.high %v893_v56, %v893_v56 }
 0x106   : > { %v1368_v24 = vcombine.high %v1366_v57, %v1366_v57  ;;  %v1457_v6 = vadd.f32 %v1366_v57, %v1118_v19  ;;  %v909_v54 = vrot.slane %v893_v56, %v2559_v30 }
 0x107   : > { %v1456_v0 = vadd.f32 %v1367_v22, %v1117_v21  ;;  %v2849_v7 = vadd.f32 %v2562_v31, %v1455_v50  ;;  %v902_v13 = vcombine.high %v900_v40, %v900_v40  ;;  %v916_v2 = vrot.slane %v900_v40, %v2559_v30 }
 0x108   : > { %v1458_v3 = vadd.f32 %v1368_v24, %v1119_v27  ;;  %v2853_v25 = vadd.f32 %v2565_v33, %v1457_v6  ;;  %v923_v19 = vrot.slane %v901_v4, %v2559_v30  ;;  %v931_v57 = vcombine.high %v909_v54, %v909_v54  ;;  %v1240_v27 = vpop.f32.mrf.mxu1 }
 0x109   : > { %v2857_v10 = vadd.f32 %v2573_v38, %v1456_v0  ;;  %v1034_v21 = vrot.slane %v909_v54, %v2569_v37  ;;  %v930_v22 = vrot.slane %v902_v13, %v2559_v30  ;;  %v932_v24 = vcombine.high %v916_v2, %v916_v2 }
 0x10a   : > { %v2862_v12 = vadd.f32 %v2583_v47, %v1458_v3  ;;  %v1050_v6 = vrot.slane %v916_v2, %v2569_v37  ;;  %v933_v56 = vcombine.high %v923_v19, %v923_v19  ;;  %v1038_v40 = vrot.slane %v923_v19, %v2569_v37 }
 0x10b   : > { %v1651_v50 = vcombine.low %v2849_v7, %v2857_v10  ;;  %v1042_v4 = vrot.slane %v931_v57, %v2569_v37  ;;  %v934_v54 = vcombine.high %v930_v22, %v930_v22  ;;  %v1054_v3 = vrot.slane %v930_v22, %v2569_v37 }
 0x10c   : > { %v1058_v13 = vrot.slane %v932_v24, %v2569_v37  ;;  %v1046_v5 = vrot.slane %v933_v56, %v2569_v37  ;;  %v1112_v2 = vsel %vm1095_vm1, %v2699_v43, %v1002_v61  ;;  %v1113_v19 = vsel %vm1095_vm1, %v2710_v49, %v1006_v14  ;;  %v2369_v24 = vpop.f32.mrf.mxu1 }
 0x10d   : > { %v1114_v57 = vsel %vm1095_vm1, %v650_v60, %v2772_v17  ;;  %v1062_v22 = vrot.slane %v934_v54, %v2569_v37  ;;  %v1335_v61 = vcombine.high %v1240_v27, %v1240_v27  ;;  %v1342_v44 = vrot.slane %v1240_v27, %v2556_v28 }
 0x10e   : > { %v1124_v14 = vsel %vm1095_vm1, %v2819_v35, %v1050_v6  ;;  %v1125_v56 = vsel %vm1095_vm1, %v698_v18, %v1054_v3  ;;  %v1126_v43 = vsel %vm1095_vm1, %v700_v29, %v1058_v13  ;;  %v1386_v60 = vcombine.high %v2369_v24, %v2369_v24 }
 0x10f   : > { %v1349_v17 = vrot.slane %v1335_v61, %v2556_v28  ;;  %v1350_v54 = vcombine.high %v1342_v44, %v1342_v44  ;;  %v1451_v0 = vadd.f32 %v1342_v44, %v1112_v2  ;;  %v1127_v49 = vsel %vm1095_vm1, %v702_v32, %v1062_v22  ;;  %v1250_v32 = vpop.f32.mrf.mxu1 }
 0x110   : > { %v1393_v51 = vrot.slane %v2369_v24, %v2556_v28  ;;  %v1400_v15 = vrot.slane %v1386_v60, %v2556_v28  ;;  %v1120_v27 = vsel %vm1095_vm1, %v2812_v23, %v1034_v21  ;;  %v1121_v35 = vsel %vm1095_vm1, %v2822_v41, %v1038_v40 }
 0x111   : > { %v1351_v18 = vcombine.high %v1349_v17, %v1349_v17  ;;  %v1452_v6 = vadd.f32 %v1350_v54, %v1113_v19  ;;  %v1453_v29 = vadd.f32 %v1349_v17, %v1114_v57  ;;  %v1510_v3 = vadd.f32 %v2562_v31, %v1451_v0 }
 0x112   : > { %v1401_v13 = vcombine.high %v1393_v51, %v1393_v51  ;;  %v1402_v61 = vcombine.high %v1400_v15, %v1400_v15  ;;  %v1463_v2 = vadd.f32 %v1393_v51, %v1124_v14  ;;  %v1465_v44 = vadd.f32 %v1400_v15, %v1126_v43 }
 0x113   : > { %v1454_v22 = vadd.f32 %v1351_v18, %v1115_v42  ;;  %v1511_v24 = vadd.f32 %v2573_v38, %v1452_v6  ;;  %v1512_v60 = vadd.f32 %v2565_v33, %v1453_v29  ;;  %v1122_v21 = vsel %vm1095_vm1, %v699_v59, %v1042_v4 }
 0x114   : > { %v1464_v40 = vadd.f32 %v1401_v13, %v1125_v56  ;;  %v1466_v19 = vadd.f32 %v1402_v61, %v1127_v49  ;;  %v1522_v57 = vadd.f32 %v2562_v31, %v1463_v2  ;;  %v1524_v0 = vadd.f32 %v2565_v33, %v1465_v44 }
 0x115   : > { %v1513_v14 = vadd.f32 %v2583_v47, %v1454_v22  ;;  %v1634_v43 = vcombine.low %v1510_v3, %v1511_v24  ;;  %v1123_v42 = vsel %vm1095_vm1, %v701_v9, %v1046_v5  ;;  %v1369_v17 = vcombine.high %v1250_v32, %v1250_v32 }
 0x116   : > { %v1523_v54 = vadd.f32 %v2573_v38, %v1464_v40  ;;  %v1525_v23 = vadd.f32 %v2583_v47, %v1466_v19  ;;  %v1376_v59 = vrot.slane %v1250_v32, %v2556_v28  ;;  %v1574_v4 = vrot.slane %v1566_v11, %v2556_v28 }
 0x117   : > { %v1635_v56 = vcombine.low %v1512_v60, %v1513_v14  ;;  %v1383_v49 = vrot.slane %v1369_v17, %v2556_v28  ;;  %v3253_v41 = vcombine.low %v2718_v45, %v2729_v8  ;;  %v3254_v5 = vcombine.low %v2638_v53, %v2650_v58 }
 0x118   : > { %v1685_v15 = vcombine.low %v1522_v57, %v1523_v54  ;;  %v1686_v18 = vcombine.low %v1524_v0, %v1525_v23  ;;  %v1384_v6 = vcombine.high %v1376_v59, %v1376_v59  ;;  %v1459_v29 = vadd.f32 %v1376_v59, %v1120_v27 }
 0x119   : > { %v1581_v9 = vrot.slane %v3253_v41, %v2556_v28  ;;  %v1591_v51 = vrot.slane %v3254_v5, %v2556_v28  ;;  %v1385_v3 = vcombine.high %v1383_v49, %v1383_v49  ;;  %v1461_v55 = vadd.f32 %v1383_v49, %v1122_v21  ;;  %v1898_v41 = vld [vmem:[%s3249_s9 + $0x18] sm:$0xff] }
 0x11a   : > { %v3255_v11 = vcombine.low %v2644_v46, %v2658_v63  ;;  %v1460_v45 = vadd.f32 %v1384_v6, %v1121_v35  ;;  %v1518_v8 = vadd.f32 %v2562_v31, %v1459_v29  ;;  %v3256_v53 = vcombine.low %v2816_v62, %v2827_v16  ;;  %2371 = vmatpush3.msra.mxu0 %v1898_v41 }
 0x11b   : > { %v2939_v34 = vcombine.low %v1574_v4, %v1581_v9  ;;  %v3257_v27 = vcombine.low %v2830_v52, %v2839_v1  ;;  %v1462_v2 = vadd.f32 %v1385_v3, %v1123_v42  ;;  %v1520_v44 = vadd.f32 %v2565_v33, %v1461_v55  ;;  %v1897_v9 = vld [vmem:[%s3249_s9 + $0x10] sm:$0xff]  ;;  %2382 = vmatpush3.msra.mxu1 %v1898_v41 }
 0x11c   : > { %v1598_v13 = vrot.slane %v3255_v11, %v2556_v28  ;;  %v1608_v58 = vrot.slane %v3256_v53, %v2556_v28  ;;  %v1642_v31 = vrot.slane %v1634_v43, %v2556_v28  ;;  %v1519_v63 = vadd.f32 %v2573_v38, %v1460_v45  ;;  %v1737_v53 = vld [vmem:[%s3243_s3] sm:$0xff]  ;;  %v1743_v41 = vld [vmem:[%s3243_s3 + $0x30] sm:$0xff] }
 0x11d   : > { %v1615_v61 = vrot.slane %v3257_v27, %v2556_v28  ;;  %1745 = vrot.lane.b32.xlu0 %v2939_v34, %s2436_s20  ;;  %v1649_v62 = vrot.slane %v1635_v56, %v2556_v28  ;;  %v3258_v16 = vcombine.low %v2741_v39, %v2751_v20  ;;  %v1521_v1 = vadd.f32 %v2583_v47, %v1462_v2  ;;  %v1738_v2 = vld [vmem:[%s3243_s3 + $0x8] sm:$0xff] }
 0x11e   : > { %v1599_v46 = vcombine.low %v1591_v51, %v1598_v13  ;;  %v3259_v33 = vcombine.low %v2747_v36, %v2761_v48  ;;  %v1659_v38 = vrot.slane %v1651_v50, %v2556_v28  ;;  %v3260_v39 = vcombine.low %v2853_v25, %v2862_v12  ;;  %v1896_v51 = vld [vmem:[%s3249_s9 + $0x8] sm:$0xff] }
 0x11f   : > { %v1616_v35 = vcombine.low %v1608_v58, %v1615_v61  ;;  %v1625_v52 = vrot.slane %v3258_v16, %v2556_v28  ;;  %v1668_v22 = vcombine.low %v1518_v8, %v1519_v63  ;;  %v1650_v47 = vcombine.low %v1642_v31, %v1649_v62  ;;  %v1526_v8 = vld [vmem:[%s3242_s2] sm:$0xff]  ;;  %v1527_v61 = vld [vmem:[%s3242_s2 + $0x8] sm:$0xff] }
 0x120   : > { %1796 = vrot.lane.b32.xlu1 %v1599_v46, %s2437_s21  ;;  %v1632_v32 = vrot.slane %v3259_v33, %v2556_v28  ;;  %v1666_v20 = vrot.slane %v3260_v39, %v2556_v28  ;;  %v1693_v24 = vrot.slane %v1685_v15, %v2556_v28  ;;  %v1700_v60 = vrot.slane %v1686_v18, %v2556_v28  ;;  %v1895_v15 = vld [vmem:[%s3249_s9] sm:$0xff]  ;;  %v1531_v16 = vld [vmem:[%s3242_s2 + $0x28] sm:$0xff] }
 0x121   : > { %v1669_v21 = vcombine.low %v1520_v44, %v1521_v1  ;;  %1794 = vrot.lane.b32.xlu0 %v2939_v34, %s2437_s21  ;;  %v1676_v7 = vrot.slane %v1668_v22, %v2556_v28  ;;  %v1710_v25 = vrot.slane %v2939_v34, 7  ;;  %v1711_v12 = vrot.slane %v1599_v46, 7  ;;  %v1530_v33 = vld [vmem:[%s3242_s2 + $0x20] sm:$0xff]  ;;  %v1532_v22 = vld [vmem:[%s3242_s2 + $0x30] sm:$0xff] }
 0x122   : > { %v1633_v36 = vcombine.low %v1625_v52, %v1632_v32  ;;  %v1667_v48 = vcombine.low %v1659_v38, %v1666_v20  ;;  %v1701_v10 = vcombine.low %v1693_v24, %v1700_v60  ;;  %v1714_v40 = vrot.slane %v1650_v47, 7  ;;  %v1528_v32 = vld [vmem:[%s3242_s2 + $0x10] sm:$0xff] }
 0x123   : > { %v1683_v50 = vrot.slane %v1669_v21, %v2556_v28  ;;  %v2989_v0 = vsel %vm1720_vm2, %v1710_v25, %v1711_v12  ;;  %v1712_v43 = vrot.slane %v1616_v35, 7  ;;  %v3261_v5 = vmov 0.0   ;;  %v1533_v21 = vld [vmem:[%s3242_s2 + $0x38] sm:$0xff] }
 0x124   : > { %1749 = vrot.lane.b32.xlu1 %v1616_v35, %s2436_s20  ;;  %v1715_v19 = vrot.slane %v1667_v48, 7  ;;  %v1713_v57 = vrot.slane %v1633_v36, 7  ;;  %v1717_v14 = vrot.slane %v1701_v10, 7  ;;  %2372 = vmatprep.subr.mxu0 %v3261_v5 }
 0x125   : > { %1747 = vrot.lane.b32.xlu0 %v1599_v46, %s2436_s20  ;;  %v1684_v42 = vcombine.low %v1676_v7, %v1683_v50  ;;  %v3006_v23 = vsel %vm1720_vm2, %v1711_v12, %v1712_v43  ;;  %2373 = vmatpush3.msra.mxu0 %v1897_v9  ;;  %v1741_v50 = vld [vmem:[%s3243_s3 + $0x20] sm:$0xff] }
 0x126   : > { %v2994_v17 = vsel %vm1720_vm2, %v1714_v40, %v1715_v19  ;;  %v2998_v54 = vsel %vm1720_vm2, %v1713_v57, %v1714_v40  ;;  %v3002_v28 = vsel %vm1720_vm2, %v1717_v14, %v1710_v25  ;;  %v3011_v4 = vsel %vm1720_vm2, %v1712_v43, %v1713_v57  ;;  %2383 = vmatprep.subr.mxu1 %v3261_v5  ;;  %v1742_v40 = vld [vmem:[%s3243_s3 + $0x28] sm:$0xff] }
 0x127   : > { %v1716_v59 = vrot.slane %v1684_v42, 7  ;;  %2374 = vmatprep.subr.mxu0 %v3261_v5  ;;  %2384 = vmatpush3.msra.mxu1 %v1897_v9  ;;  %v1729_v31 = vmul.f32 %v3002_v28, %v1526_v8  ;;  %v1734_v60 = vmul.f32 %v2994_v17, %v1531_v16  ;;  %v1733_v7 = vmul.f32 %v2998_v54, %v1530_v33  ;;  %v1739_v54 = vld [vmem:[%s3243_s3 + $0x10] sm:$0xff] }
 0x128   : > { %1753 = vrot.lane.b32.xlu1 %v1650_v47, %s2436_s20  ;;  %2375 = vmatpush3.msra.mxu0 %v1896_v51  ;;  %v1731_v25 = vmul.f32 %v3006_v23, %v1528_v32 }
 0x129   : > { %1751 = vrot.lane.b32.xlu0 %v1633_v36, %s2436_s20  ;;  %v3016_v56 = vsel %vm1720_vm2, %v1715_v19, %v1716_v59  ;;  %v3020_v49 = vsel %vm1720_vm2, %v1716_v59, %v1717_v14  ;;  %2385 = vmatprep.subr.mxu1 %v3261_v5 }
 0x12a   : > { %2386 = vmatpush3.msra.mxu1 %v1896_v51  ;;  %2376 = vmatprep.subr.mxu0 %v3261_v5  ;;  %v1735_v57 = vmul.f32 %v3016_v56, %v1532_v22  ;;  %v1736_v28 = vmul.f32 %v3020_v49, %v1533_v21 }
 0x12b   : > { %2387 = vmatprep.subr.mxu1 %v3261_v5  ;;  %2377 = vmatpush3.msra.mxu0 %v1895_v15 }
 0x12c   : > { %1804 = vrot.lane.b32.xlu1 %v1667_v48, %s2437_s21  ;;  %2388 = vmatpush3.msra.mxu1 %v1895_v15 }
 0x12d   : > { %1802 = vrot.lane.b32.xlu0 %v1650_v47, %s2437_s21  ;;  %2378 = vmatprep.mubr.msk.f32.mxu0 %vm2439_vm3, %v3261_v5 }
 0x12e   : > { %2389 = vmatprep.mubr.msk.f32.mxu1 %vm2439_vm3, %v3261_v5 }
 0x130   : > { %1757 = vrot.lane.b32.xlu1 %v1684_v42, %s2436_s20 }
 0x131   : > { %1755 = vrot.lane.b32.xlu0 %v1667_v48, %s2436_s20 }
 0x134   : > { %1759 = vrot.lane.b32.xlu1 %v1701_v10, %s2436_s20 }
 0x135   : > { %1798 = vrot.lane.b32.xlu0 %v1616_v35, %s2437_s21 }
 0x138   : > { %1806 = vrot.lane.b32.xlu1 %v1684_v42, %s2437_s21 }
 0x139   : > { %1800 = vrot.lane.b32.xlu0 %v1633_v36, %s2437_s21 }
 0x13c   : > { %1808 = vrot.lane.b32.xlu1 %v1701_v10, %s2437_s21 }
 0x13d   : > { %2196 = vrot.lane.b32.xlu0 %v2939_v34, %s2438_s22 }
 0x140   : > { %2198 = vrot.lane.b32.xlu1 %v1599_v46, %s2438_s22 }
 0x141   : > { %2200 = vrot.lane.b32.xlu0 %v1616_v35, %s2438_s22  ;;  %v1730_v35 = vmul.f32 %v2989_v0, %v1527_v61 }
 0x144   : > { %2202 = vrot.lane.b32.xlu1 %v1633_v36, %s2438_s22 }
 0x145   : > { %2204 = vrot.lane.b32.xlu0 %v1650_v47, %s2438_s22  ;;  %v1529_v47 = vld [vmem:[%s3242_s2 + $0x18] sm:$0xff] }
 0x146   : > { %v1732_v0 = vmul.f32 %v3011_v4, %v1529_v47 }
 0x148   : > { %2206 = vrot.lane.b32.xlu1 %v1667_v48, %s2438_s22 }
 0x149   : > { %2208 = vrot.lane.b32.xlu0 %v1684_v42, %s2438_s22 }
 0x14c   : > { %2210 = vrot.lane.b32.xlu1 %v1701_v10, %s2438_s22 }
 0x18f   : > { %v3052_v18 = vpop.permute.xlu0 %1745 }
 0x190   : > { %v1769_v11 = vrot.slane %v3052_v18, 1 }
 0x192   : > { %v1797_v6 = vpop.permute.xlu1 %1796 }
 0x193   : > { %v1795_v29 = vpop.permute.xlu0 %1794  ;;  %v1819_v38 = vadd.f32 %v1797_v6, %v1730_v35  ;;  %v1740_v6 = vld [vmem:[%s3243_s3 + $0x18] sm:$0xff] }
 0x194   : > { %v1818_v1 = vadd.f32 %v1795_v29, %v1729_v31 }
 0x196   : > { %v1750_v3 = vpop.permute.xlu1 %1749 }
 0x197   : > { %v1748_v55 = vpop.permute.xlu0 %1747  ;;  %v1771_v45 = vrot.slane %v1750_v3, 1 }
 0x198   : > { %v1770_v34 = vrot.slane %v1748_v55, 1 }
 0x19a   : > { %v1754_v13 = vpop.permute.xlu1 %1753  ;;  %v1784_v58 = vsel %vm1777_vm4, %v1769_v11, %v1770_v34  ;;  %v1783_v44 = vsel %vm1777_vm4, %v1770_v34, %v1771_v45 }
 0x19b   : > { %v1752_v27 = vpop.permute.xlu0 %1751  ;;  %v1786_v63 = vmul.f32 %v1784_v58, %v1737_v53  ;;  %v1787_v62 = vmul.f32 %v1783_v44, %v1738_v2  ;;  %v1773_v48 = vrot.slane %v1754_v13, 1 }
 0x19c   : > { %v1772_v39 = vrot.slane %v1752_v27, 1 }
 0x19d   : > { %v3091_v24 = vadd.f32 %v1818_v1, %v1786_v63  ;;  %v3097_v36 = vadd.f32 %v1819_v38, %v1787_v62 }
 0x19e   : > { %v1805_v46 = vpop.permute.xlu1 %1804  ;;  %v1781_v14 = vsel %vm1777_vm4, %v1772_v39, %v1773_v48  ;;  %v1782_v43 = vsel %vm1777_vm4, %v1771_v45, %v1772_v39 }
 0x19f   : > { %v1803_v52 = vpop.permute.xlu0 %1802  ;;  %v1823_v42 = vadd.f32 %v1805_v46, %v1734_v60  ;;  %v1861_v23 = vmul.f32 %v3091_v24, %v3091_v24  ;;  %v1862_v9 = vmul.f32 %v3097_v36, %v3097_v36  ;;  %v1788_v3 = vmul.f32 %v1782_v43, %v1739_v54 }
 0x1a0   : > { %v1822_v5 = vadd.f32 %v1803_v52, %v1733_v7  ;;  %v1836_v55 = vsel %vm1834_vm5, %v3097_v36, 0.0  ;;  %v1835_v8 = vsel %vm1834_vm5, %v3091_v24, 0.0  ;;  %v1789_v44 = vmul.f32 %v1781_v14, %v1740_v6 }
 0x1a1   : > { %v1869_v16 = vsel %vm1834_vm5, %v1861_v23, 0.0 }
 0x1a2   : > { %v1758_v20 = vpop.permute.xlu1 %1757 }
 0x1a3   : > { %v1756_v10 = vpop.permute.xlu0 %1755  ;;  %v1775_v12 = vrot.slane %v1758_v20, 1  ;;  %v1837_v20 = vadd.f32 %v1836_v55, %v1835_v8 }
 0x1a4   : > { %v1774_v19 = vrot.slane %v1756_v10, 1 }
 0x1a6   : > { %v1760_v17 = vpop.permute.xlu1 %1759  ;;  %v1779_v59 = vsel %vm1777_vm4, %v1774_v19, %v1775_v12  ;;  %v1780_v4 = vsel %vm1777_vm4, %v1773_v48, %v1774_v19 }
 0x1a7   : > { %v1776_v56 = vrot.slane %v1760_v17, 1  ;;  %v1790_v51 = vmul.f32 %v1780_v4, %v1741_v50  ;;  %v1791_v49 = vmul.f32 %v1779_v59, %v1742_v40  ;;  %v1799_v15 = vpop.permute.xlu0 %1798 }
 0x1a8   : > { %v1820_v34 = vadd.f32 %v1799_v15, %v1731_v25 }
 0x1a9   : > { %v1778_v29 = vsel %vm1777_vm4, %v1775_v12, %v1776_v56  ;;  %v3135_v13 = vadd.f32 %v1822_v5, %v1790_v51  ;;  %v3137_v45 = vadd.f32 %v1823_v42, %v1791_v49  ;;  %v1785_v27 = vsel %vm1777_vm4, %v1776_v56, %v1769_v11 }
 0x1aa   : > { %v1792_v53 = vmul.f32 %v1778_v29, %v1743_v41  ;;  %v1807_v58 = vpop.permute.xlu1 %1806  ;;  %v3145_v61 = vadd.f32 %v1820_v34, %v1788_v3  ;;  %v1870_v11 = vsel %vm1834_vm5, %v1862_v9, 0.0  ;;  %v1793_v60 = vmul.f32 %v1785_v27, %v1744_v26 }
 0x1ab   : > { %v1824_v2 = vadd.f32 %v1807_v58, %v1735_v57  ;;  %v1865_v46 = vmul.f32 %v3135_v13, %v3135_v13  ;;  %v1866_v31 = vmul.f32 %v3137_v45, %v3137_v45  ;;  %v1848_v63 = vsel %vm1834_vm5, %v3135_v13, 0.0  ;;  %v1801_v18 = vpop.permute.xlu0 %1800 }
 0x1ac   : > { %v1849_v35 = vsel %vm1834_vm5, %v3137_v45, 0.0  ;;  %v1863_v62 = vmul.f32 %v3145_v61, %v3145_v61  ;;  %v1838_v1 = vsel %vm1834_vm5, %v3145_v61, 0.0  ;;  %v1821_v38 = vadd.f32 %v1801_v18, %v1732_v0 }
 0x1ad   : > { %v3162_v52 = vadd.f32 %v1824_v2, %v1792_v53  ;;  %v1882_v33 = vsel %vm1834_vm5, %v1865_v46, 0.0  ;;  %v1883_v32 = vsel %vm1834_vm5, %v1866_v31, 0.0  ;;  %v1850_v22 = vadd.f32 %v1849_v35, %v1848_v63 }
 0x1ae   : > { %v1809_v39 = vpop.permute.xlu1 %1808  ;;  %v1872_v21 = vsel %vm1834_vm5, %v1863_v62, 0.0  ;;  %v3173_v7 = vadd.f32 %v1821_v38, %v1789_v44  ;;  %v1839_v25 = vadd.f32 %v1838_v1, %v1837_v20  ;;  %v1871_v12 = vadd.f32 %v1870_v11, %v1869_v16 }
 0x1af   : > { %v1867_v47 = vmul.f32 %v3162_v52, %v3162_v52  ;;  %v1851_v48 = vsel %vm1834_vm5, %v3162_v52, 0.0  ;;  %v1825_v10 = vadd.f32 %v1809_v39, %v1736_v28  ;;  %v1884_v50 = vadd.f32 %v1883_v32, %v1882_v33 }
 0x1b0   : > { %v1840_v19 = vsel %vm1834_vm5, %v3173_v7, 0.0  ;;  %v1864_v57 = vmul.f32 %v3173_v7, %v3173_v7  ;;  %v1873_v14 = vadd.f32 %v1872_v21, %v1871_v12  ;;  %v1852_v43 = vadd.f32 %v1851_v48, %v1850_v22 }
 0x1b1   : > { %v1885_v40 = vsel %vm1834_vm5, %v1867_v47, 0.0  ;;  %v3180_v0 = vadd.f32 %v1825_v10, %v1793_v60  ;;  %v1841_v42 = vadd.f32 %v1840_v19, %v1839_v25  ;;  %v2330_v10 = vld [vmem:[%s3247_s7] ss:$0 sm:$0xff] }
 0x1b2   : > { %v1874_v17 = vsel %vm1834_vm5, %v1864_v57, 0.0  ;;  %v1886_v23 = vadd.f32 %v1885_v40, %v1884_v50  ;;  %v2331_v50 = vld [vmem:[%s3248_s8] ss:$0 sm:$0xff] }
 0x1b3   : > { %v1853_v54 = vsel %vm1834_vm5, %v3180_v0, 0.0  ;;  %v1868_v28 = vmul.f32 %v3180_v0, %v3180_v0  ;;  %v1842_v59 = vrot.slane %v1841_v42, 4  ;;  %v1875_v4 = vadd.f32 %v1874_v17, %v1873_v14 }
 0x1b4   : > { %v1854_v56 = vadd.f32 %v1853_v54, %v1852_v43 }
 0x1b5   : > { %v1887_v41 = vsel %vm1834_vm5, %v1868_v28, 0.0  ;;  %v1843_v9 = vadd.f32 %v1842_v59, %v1841_v42  ;;  %v1876_v5 = vrot.slane %v1875_v4, 4 }
 0x1b6   : > { %v1855_v51 = vrot.slane %v1854_v56, 4  ;;  %v1888_v49 = vadd.f32 %v1887_v41, %v1886_v23 }
 0x1b7   : > { %v1844_v15 = vrot.slane %v1843_v9, 2  ;;  %v1877_v6 = vadd.f32 %v1876_v5, %v1875_v4 }
 0x1b8   : > { %v1856_v29 = vadd.f32 %v1855_v51, %v1854_v56  ;;  %v1889_v3 = vrot.slane %v1888_v49, 4 }
 0x1b9   : > { %v1845_v55 = vadd.f32 %v1844_v15, %v1843_v9  ;;  %v1878_v34 = vrot.slane %v1877_v6, 2 }
 0x1ba   : > { %v1857_v8 = vrot.slane %v1856_v29, 2  ;;  %v1890_v53 = vadd.f32 %v1889_v3, %v1888_v49 }
 0x1bb   : > { %v1846_v58 = vrot.slane %v1845_v55, 1  ;;  %v1879_v27 = vadd.f32 %v1878_v34, %v1877_v6 }
 0x1bc   : > { %v1858_v2 = vadd.f32 %v1857_v8, %v1856_v29  ;;  %v1891_v44 = vrot.slane %v1890_v53, 2 }
 0x1bd   : > { %v1880_v63 = vrot.slane %v1879_v27, 1  ;;  %v1847_v35 = vadd.f32 %v1846_v58, %v1845_v55 }
 0x1be   : > { %v1859_v46 = vrot.slane %v1858_v2, 1  ;;  %v1892_v31 = vadd.f32 %v1891_v44, %v1890_v53 }
 0x1bf   : > { %v1881_v62 = vadd.f32 %v1880_v63, %v1879_v27 }
 0x1c0   : > { %v1860_v18 = vadd.f32 %v1859_v46, %v1858_v2  ;;  %v1893_v26 = vrot.slane %v1892_v31, 1  ;;  %v2199_v46 = vpop.permute.xlu1 %2198 }
 0x1c2   : > { %v1902_v11 = vsel %vm1901_vm6, %v1860_v18, %v1847_v35  ;;  %v1894_v16 = vadd.f32 %v1893_v26, %v1892_v31 }
 0x1c3   : > { %2379 = vmatmul.mubr.msk.f32.vlgmr.msra.gmra.mxu0 %vm1834_vm5, %v1902_v11 }
 0x1c4   : > { %v1978_v1 = vsel %vm1901_vm6, %v1894_v16, %v1881_v62  ;;  %v2203_v31 = vpop.permute.xlu1 %2202 }
 0x1c5   : > { %2390 = vmatmul.mubr.msk.f32.vlgmr.msra.gmra.mxu1 %vm1834_vm5, %v1978_v1 }
 0x283   : > { %v1971_v33 = vpop.f32.mrf.mxu0 }
 0x284   : > { %v1975_v32 = vmul.f32 0.0078125, %v1971_v33 }
 0x285   : > { %v2380_v38 = vpop.f32.mrf.mxu0  ;;  %v2047_v39 = vpop.f32.mrf.mxu1 }
 0x286   : > { %v2052_v20 = vmul.f32 %v1975_v32, %v1975_v32  ;;  %v2051_v22 = vmul.f32 0.0078125, %v2047_v39 }
 0x287   : > { %v2391_v47 = vpop.f32.mrf.mxu1 }
 0x288   : > { %v2053_v60 = vsub.f32 %v2051_v22, %v2052_v20 }
 0x28a   : > { %v2054_v21 = vmax.f32 %v2053_v60, 0.0 }
 0x28c   : > { %v2055_v48 = vadd.f32 1e-05, %v2054_v21 }
 0x28e   : > { %2407 = vrsqrt.f32 %v2055_v48  ;;  %v2207_v48 = vpop.permute.xlu1 %2206 }
 0x29b   : > { %v2408_v25 = vpop.eup %2407 }
 0x29c   : > { %v2064_v12 = vmul.f32 %v2408_v25, %v2330_v10 }
 0x29e   : > { %v2066_v40 = vmul.f32 %v2064_v12, %v1975_v32  ;;  %v2081_v19 = vrot.slane %v2064_v12, %v2559_v30 }
 0x2a0   : > { %v2073_v57 = vsub.f32 %v2331_v50, %v2066_v40  ;;  %v2082_v14 = vcombine.high %v2081_v19, %v2081_v19  ;;  %v2089_v43 = vrot.slane %v2081_v19, %v2559_v30 }
 0x2a2   : > { %v2096_v42 = vrot.slane %v2082_v14, %v2559_v30  ;;  %v2114_v17 = vrot.slane %v2073_v57, %v2559_v30  ;;  %v2100_v54 = vrot.slane %v2089_v43, %v2569_v37 }
 0x2a4   : > { %v2115_v28 = vcombine.high %v2114_v17, %v2114_v17  ;;  %v2122_v23 = vrot.slane %v2114_v17, %v2559_v30  ;;  %v2104_v59 = vrot.slane %v2096_v42, %v2569_v37  ;;  %v2140_v41 = vmul.f32 %v2100_v54, %v3091_v24 }
 0x2a5   : > { %v2141_v9 = vmul.f32 %v2100_v54, %v3097_v36  ;;  %v2142_v5 = vmul.f32 %v2100_v54, %v3145_v61  ;;  %v2143_v49 = vmul.f32 %v2100_v54, %v3173_v7 }
 0x2a6   : > { %v2129_v4 = vrot.slane %v2115_v28, %v2559_v30  ;;  %v2133_v56 = vrot.slane %v2122_v23, %v2569_v37  ;;  %v2144_v15 = vmul.f32 %v2104_v59, %v3135_v13  ;;  %v2145_v55 = vmul.f32 %v2104_v59, %v3137_v45 }
 0x2a7   : > { %v2146_v34 = vmul.f32 %v2104_v59, %v3162_v52  ;;  %v2147_v24 = vmul.f32 %v2104_v59, %v3180_v0  ;;  %v2197_v52 = vpop.permute.xlu0 %2196 }
 0x2a8   : > { %v2137_v51 = vrot.slane %v2129_v4, %v2569_v37  ;;  %v2148_v6 = vadd.f32 %v2140_v41, %v2133_v56  ;;  %v2149_v29 = vadd.f32 %v2141_v9, %v2133_v56  ;;  %v2150_v3 = vadd.f32 %v2142_v5, %v2133_v56 }
 0x2a9   : > { %v2151_v30 = vadd.f32 %v2143_v49, %v2133_v56 }
 0x2aa   : > { %v2152_v8 = vadd.f32 %v2144_v15, %v2137_v51  ;;  %v2153_v36 = vadd.f32 %v2145_v55, %v2137_v51  ;;  %v2154_v53 = vadd.f32 %v2146_v34, %v2137_v51  ;;  %v2164_v61 = vmul.f32 0.70710677, %v2148_v6 }
 0x2ab   : > { %v2165_v58 = vmul.f32 0.70710677, %v2149_v29  ;;  %v2166_v37 = vmul.f32 0.70710677, %v2150_v3  ;;  %v2155_v27 = vadd.f32 %v2147_v24, %v2137_v51  ;;  %v2167_v7 = vmul.f32 0.70710677, %v2151_v30  ;;  %v2201_v0 = vpop.permute.xlu0 %2200 }
 0x2ac   : > { %v2168_v2 = vmul.f32 0.70710677, %v2152_v8  ;;  %2409 = verf.f32 %v2164_v61  ;;  %v2169_v13 = vmul.f32 0.70710677, %v2153_v36  ;;  %v2170_v44 = vmul.f32 0.70710677, %v2154_v53 }
 0x2ad   : > { %2411 = verf.f32 %v2165_v58  ;;  %v2171_v45 = vmul.f32 0.70710677, %v2155_v27  ;;  %v2156_v18 = vmul.f32 0.5, %v2148_v6  ;;  %v2157_v62 = vmul.f32 0.5, %v2149_v29  ;;  %v2211_v6 = vpop.permute.xlu1 %2210 }
 0x2ae   : > { %2413 = verf.f32 %v2166_v37  ;;  %v2158_v33 = vmul.f32 0.5, %v2150_v3  ;;  %v2159_v22 = vmul.f32 0.5, %v2151_v30  ;;  %v2160_v10 = vmul.f32 0.5, %v2152_v8 }
 0x2af   : > { %2415 = verf.f32 %v2167_v7  ;;  %v2205_v20 = vpop.permute.xlu0 %2204  ;;  %v2161_v19 = vmul.f32 0.5, %v2153_v36  ;;  %v2162_v17 = vmul.f32 0.5, %v2154_v53  ;;  %v2163_v59 = vmul.f32 0.5, %v2155_v27 }
 0x2b0   : > { %2417 = verf.f32 %v2168_v2 }
 0x2b1   : > { %2419 = verf.f32 %v2169_v13 }
 0x2b2   : > { %2421 = verf.f32 %v2170_v44 }
 0x2b3   : > { %2423 = verf.f32 %v2171_v45  ;;  %v2209_v51 = vpop.permute.xlu0 %2208 }
 0x2b9   : > { %v2410_v63 = vpop.eup %2409 }
 0x2ba   : > { %v2412_v35 = vpop.eup %2411  ;;  %v2180_v26 = vadd.f32 1.0, %v2410_v63 }
 0x2bb   : > { %v2414_v11 = vpop.eup %2413  ;;  %v2181_v16 = vadd.f32 1.0, %v2412_v35 }
 0x2bc   : > { %v2416_v1 = vpop.eup %2415  ;;  %v2182_v32 = vadd.f32 1.0, %v2414_v11  ;;  %v2188_v38 = vmul.f32 %v2180_v26, %v2156_v18 }
 0x2bd   : > { %v2418_v39 = vpop.eup %2417  ;;  %v2183_v47 = vadd.f32 1.0, %v2416_v1  ;;  %v2189_v60 = vmul.f32 %v2181_v16, %v2157_v62 }
 0x2be   : > { %v2420_v21 = vpop.eup %2419  ;;  %v2184_v25 = vadd.f32 1.0, %v2418_v39  ;;  %v2190_v12 = vmul.f32 %v2182_v32, %v2158_v33  ;;  %v2220_v50 = vadd.f32 %v2197_v52, %v2188_v38 }
 0x2bf   : > { %v2422_v40 = vpop.eup %2421  ;;  %v2185_v57 = vadd.f32 1.0, %v2420_v21  ;;  %v2191_v14 = vmul.f32 %v2183_v47, %v2159_v22  ;;  %v2221_v43 = vadd.f32 %v2199_v46, %v2189_v60 }
 0x2c0   : > { %v2424_v42 = vpop.eup %2423  ;;  %v2186_v54 = vadd.f32 1.0, %v2422_v40  ;;  %v2192_v28 = vmul.f32 %v2184_v25, %v2160_v10  ;;  %v2222_v23 = vadd.f32 %v2201_v0, %v2190_v12  ;;  %2228 = vst.msk [vmem:[%s3219_s18] sm:$0xff] %vm1834_vm5, %v2220_v50 }
 0x2c1   : > { %v2187_v4 = vadd.f32 1.0, %v2424_v42  ;;  %v2193_v56 = vmul.f32 %v2185_v57, %v2161_v19  ;;  %v2223_v41 = vadd.f32 %v2203_v31, %v2191_v14  ;;  %2229 = vst.msk [vmem:[%s3219_s18 + $0x8] sm:$0xff] %vm1834_vm5, %v2221_v43 }
 0x2c2   : > { %v2194_v9 = vmul.f32 %v2186_v54, %v2162_v17  ;;  %v2224_v5 = vadd.f32 %v2205_v20, %v2192_v28  ;;  %2230 = vst.msk [vmem:[%s3219_s18 + $0x10] sm:$0xff] %vm1834_vm5, %v2222_v23 }
 0x2c3   : > { %v2195_v49 = vmul.f32 %v2187_v4, %v2163_v59  ;;  %v2225_v15 = vadd.f32 %v2207_v48, %v2193_v56  ;;  %2231 = vst.msk [vmem:[%s3219_s18 + $0x18] sm:$0xff] %vm1834_vm5, %v2223_v41 }
 0x2c4   : > { %v2226_v29 = vadd.f32 %v2209_v51, %v2194_v9  ;;  %2232 = vst.msk [vmem:[%s3219_s18 + $0x20] sm:$0xff] %vm1834_vm5, %v2224_v5 }
 0x2c5   : > { %v2227_v3 = vadd.f32 %v2211_v6, %v2195_v49  ;;  %2233 = vst.msk [vmem:[%s3219_s18 + $0x28] sm:$0xff] %vm1834_vm5, %v2225_v15 }
 0x2c6   : > { %2234 = vst.msk [vmem:[%s3219_s18 + $0x30] sm:$0xff] %vm1834_vm5, %v2226_v29 }
 0x2c7   : > { %2235 = vst.msk [vmem:[%s3219_s18 + $0x38] sm:$0xff] %vm1834_vm5, %v2227_v3 }
 0x2c8 PF: > { %s20_s13 = sadd.s32 1, %s2431_s13  }
 0x2c9   : > { %p17_p5 = scmp.ge.s32.totalorder %s20_s13, 4  }
 0x2cb   :  { %19 = sbr.rel (!%p17_p5) target bundleno = 1 (0x1), region = 93 }

</bundles_post_ra>
